<compile_context>
chip_gen: v7x
topology: tpu7x:2x2x1
jax: 0.10.0
libtpu: 0.0.40
codegen_flags: <defaults>
</compile_context>

<pallas_src>
import jax
import jax.numpy as jnp
from jax import lax
from jax.experimental import pallas as pl
from jax.experimental.pallas import tpu as pltpu


# ---------------------------------------------------------------------------
# Kernel factory: one batch tile of TB examples per grid step.
# ---------------------------------------------------------------------------
def make_net_kernel(TB):
    def net_kernel(x_ref, w1e_ref, w1o_ref, b1_ref, w2e_ref, w2o_ref, b2_ref,
                   fw1_ref, fb1_ref, fw2_ref, fb2_ref, fw3_ref, fb3_ref,
                   o_ref, t1_ref, t2_ref, feat_ref):
        f32 = jnp.float32
        b1 = b1_ref[...]                                       # (1, 84)
        b2 = b2_ref[...]                                       # (1, 96)

        # ---- conv / pool path, per example (unrolled over the tile) ----
        for bi in range(TB):
            x = x_ref[bi]                                      # (30, 30)

            # conv1 (3x3, 1->6) + width max-pool via 3 banded matmuls
            a = x[0:28, :]
            ev = jnp.dot(a, w1e_ref[0], preferred_element_type=f32)   # (28, 84)
            od = jnp.dot(a, w1o_ref[0], preferred_element_type=f32)
            for ki in (1, 2):
                a = x[ki:ki + 28, :]
                ev = ev + jnp.dot(a, w1e_ref[ki], preferred_element_type=f32)
                od = od + jnp.dot(a, w1o_ref[ki], preferred_element_type=f32)
            t1_ref[...] = jnp.maximum(ev, od)                  # W-pooled, pre-bias
            # height pool (rows 2i vs 2i+1), then bias + relu (commute with max)
            p1 = jnp.maximum(t1_ref[pl.ds(0, 14, 2), :],
                             t1_ref[pl.ds(1, 14, 2), :])       # (14, 84)
            p1 = jnp.maximum(p1 + b1, 0.0)                     # [ih, iw*6+ci]

            # conv2 (3x3, 6->16) + width max-pool via 3 banded matmuls
            a2 = p1[0:12, :]
            ev2 = jnp.dot(a2, w2e_ref[0], preferred_element_type=f32)  # (12, 96)
            od2 = jnp.dot(a2, w2o_ref[0], preferred_element_type=f32)
            for ki in (1, 2):
                a2 = p1[ki:ki + 12, :]
                ev2 = ev2 + jnp.dot(a2, w2e_ref[ki], preferred_element_type=f32)
                od2 = od2 + jnp.dot(a2, w2o_ref[ki], preferred_element_type=f32)
            t2_ref[...] = jnp.maximum(ev2, od2)                # W-pooled, pre-bias
            p2 = jnp.maximum(t2_ref[pl.ds(0, 6, 2), :],
                             t2_ref[pl.ds(1, 6, 2), :])        # (6, 96)
            p2 = jnp.maximum(p2 + b2, 0.0)                     # [h, w*16+c]

            # pack (6,96) -> row bi of (TB,576) in (h, w, c) order
            for h in range(6):
                feat_ref[bi:bi + 1, h * 96:(h + 1) * 96] = p2[h:h + 1, :]

        # ---- batched FC head: whole tile at once on the MXU ----
        feat = feat_ref[...]                                   # (TB, 576)
        z1 = jnp.dot(feat, fw1_ref[...], preferred_element_type=f32) + fb1_ref[...]
        z1 = jnp.maximum(z1, 0.0)                              # (TB, 128)
        z2 = jnp.dot(z1, fw2_ref[...], preferred_element_type=f32) + fb2_ref[...]
        z2 = jnp.maximum(z2, 0.0)                              # (TB, 64)
        # fc3: output width 1 -> lane reduction (XLU) instead of an N=1 matmul
        z3 = jnp.sum(z2 * fw3_ref[...], axis=-1, keepdims=True) + fb3_ref[...]
        o_ref[...] = 1.0 / (1.0 + jnp.exp(-z3))                # (TB, 1)

    return net_kernel


# ---------------------------------------------------------------------------
# One-time weight re-layout (hoisted out of the per-call path).
# ---------------------------------------------------------------------------
def prepare_params(params):
    c1w, c1b, c2w, c2b, f1w, f1b, f2w, f2b, f3w, f3b = params
    f32 = jnp.float32

    # conv1 banded weights: w1e/o[ki, iw, ow'*6+co] = w1[co,0,ki, iw-(2ow'(+1))]
    w1t = jnp.transpose(c1w[:, 0], (1, 2, 0)).astype(f32)       # (ki, kj, co)
    iw = jnp.arange(30)[None, :, None]
    owp = jnp.arange(14)[None, None, :]
    kj = jnp.arange(3)[:, None, None]
    sel_e = (iw == 2 * owp + kj).astype(f32)                    # (3, 30, 14)
    sel_o = (iw == 2 * owp + 1 + kj).astype(f32)
    w1e = jnp.einsum('jip,kjc->kipc', sel_e, w1t).reshape(3, 30, 84)
    w1o = jnp.einsum('jip,kjc->kipc', sel_o, w1t).reshape(3, 30, 84)
    b1r = jnp.tile(c1b.astype(f32), (14,)).reshape(1, 84)

    # conv2 banded weights: rows packed (iw,ci)->iw*6+ci, cols (ow',co)->ow'*16+co
    w2t = jnp.transpose(c2w, (2, 3, 1, 0)).astype(f32)          # (ki, kj, ci, co)
    iw2 = jnp.arange(14)[None, :, None]
    ow2p = jnp.arange(6)[None, None, :]
    kj2 = jnp.arange(3)[:, None, None]
    sel2_e = (iw2 == 2 * ow2p + kj2).astype(f32)                # (3, 14, 6)
    sel2_o = (iw2 == 2 * ow2p + 1 + kj2).astype(f32)
    w2e = jnp.einsum('jiq,kjcd->kicqd', sel2_e, w2t).reshape(3, 84, 96)
    w2o = jnp.einsum('jiq,kjcd->kicqd', sel2_o, w2t).reshape(3, 84, 96)
    b2r = jnp.tile(c2b.astype(f32), (6,)).reshape(1, 96)

    # fc1 columns: torch flatten order (c,h,w) -> kernel feature order (h,w,c)
    fw1p = jnp.transpose(f1w.reshape(128, 16, 6, 6), (2, 3, 1, 0))
    fw1p = fw1p.reshape(576, 128).astype(f32)
    fb1 = f1b.reshape(1, 128).astype(f32)
    fw2 = f2w.T.astype(f32)                                     # (128, 64)
    fb2 = f2b.reshape(1, 64).astype(f32)
    fw3 = f3w.reshape(1, 64).astype(f32)
    fb3 = f3b.reshape(1, 1).astype(f32)
    return (w1e, w1o, b1r, w2e, w2o, b2r, fw1p, fb1, fw2, fb2, fw3, fb3)


# ---------------------------------------------------------------------------
# Wrapper: minimal per-call work (C=1 reshape is a pure relabel) + pallas_call.
# ---------------------------------------------------------------------------
@jax.jit
def forward_pallas(x_nchw, prepped):
    (w1e, w1o, b1r, w2e, w2o, b2r, fw1p, fb1, fw2, fb2, fw3, fb3) = prepped
    B = x_nchw.shape[0]
    x = x_nchw.reshape(B, 30, 30).astype(jnp.float32)

    TB = B if B <= 8 else 8                      # batch-tile per grid step
    B_pad = ((B + TB - 1) // TB) * TB
    if B_pad != B:
        x = jnp.pad(x, ((0, B_pad - B), (0, 0), (0, 0)))

    weights = (w1e, w1o, b1r, w2e, w2o, b2r, fw1p, fb1, fw2, fb2, fw3, fb3)

    def wspec(a):
        nd = a.ndim
        return pl.BlockSpec(a.shape, lambda b, _nd=nd: (0,) * _nd)

    out = pl.pallas_call(
        make_net_kernel(TB),
        out_shape=jax.ShapeDtypeStruct((B_pad, 1), jnp.float32),
        grid=(B_pad // TB,),
        in_specs=[pl.BlockSpec((TB, 30, 30), lambda b: (b, 0, 0))]
                 + [wspec(a) for a in weights],
        out_specs=pl.BlockSpec((TB, 1), lambda b: (b, 0)),
        scratch_shapes=[
            pltpu.VMEM((28, 84), jnp.float32),    # conv1 W-pooled (pre-bias)
            pltpu.VMEM((12, 96), jnp.float32),    # conv2 W-pooled (pre-bias)
            pltpu.VMEM((TB, 576), jnp.float32),   # packed fc1 features (tile)
        ],
        compiler_params=pltpu.CompilerParams(dimension_semantics=("parallel",)),
    )(x, *weights)
    return out[:B]


# ---------------------------------------------------------------------------
# Pure-JAX reference (identical to the PyTorch forward, NCHW / OIHW).
# ---------------------------------------------------------------------------
def forward_reference(x_nchw, params):
    c1w, c1b, c2w, c2b, f1w, f1b, f2w, f2b, f3w, f3b = params

    def conv(x, w, b):
        y = lax.conv_general_dilated(
            x, w, window_strides=(1, 1), padding='VALID',
            dimension_numbers=('NCHW', 'OIHW', 'NCHW'))
        return y + b[None, :, None, None]

    def pool(y):  # 2x2 max pool, stride 2
        B, C, H, W = y.shape
        return y.reshape(B, C, H // 2, 2, W // 2, 2).max(axis=(3, 5))

    y = pool(jax.nn.relu(conv(x_nchw, c1w, c1b)))
    y = pool(jax.nn.relu(conv(y, c2w, c2b)))
    y = y.reshape(y.shape[0], -1)                       # (B, 16*6*6), (c,h,w) order
    y = jax.nn.relu(y @ f1w.T + f1b)
    y = jax.nn.relu(y @ f2w.T + f2b)
    y = jax.nn.sigmoid(y @ f3w.T + f3b)
    return y


# ---------------------------------------------------------------------------
# Deterministic parameter init (PyTorch-style uniform(-1/sqrt(fan_in), ...)).
# ---------------------------------------------------------------------------
def init_params(key):
    ks = jax.random.split(key, 10)

    def u(k, shape, fan_in):
        bound = 1.0 / float(fan_in) ** 0.5
        return jax.random.uniform(k, shape, jnp.float32, -bound, bound)

    return (
        u(ks[0], (6, 1, 3, 3), 1 * 3 * 3),   # conv1.weight
        u(ks[1], (6,),        1 * 3 * 3),    # conv1.bias
        u(ks[2], (16, 6, 3, 3), 6 * 3 * 3),  # conv2.weight
        u(ks[3], (16,),        6 * 3 * 3),   # conv2.bias
        u(ks[4], (128, 576), 576),           # fc1.weight
        u(ks[5], (128,),     576),           # fc1.bias
        u(ks[6], (64, 128), 128),            # fc2.weight
        u(ks[7], (64,),     128),            # fc2.bias
        u(ks[8], (1, 64), 64),               # fc3.weight
        u(ks[9], (1,),    64),               # fc3.bias
    )


if __name__ == "__main__":
    key = jax.random.PRNGKey(0)
    pkey, xkey = jax.random.split(key)
    params = init_params(pkey)
    prepped = prepare_params(params)     # one-time weight re-layout

    # fc1 expects 16*6*6 features => input spatial size is 30x30, 1 channel.
    B = 2
    x = jax.random.normal(xkey, (B, 1, 30, 30), jnp.float32)

    out = jax.block_until_ready(forward_pallas(x, prepped))
    ref = forward_reference(x, params)

    assert out.shape == (B, 1), out.shape
    assert jnp.allclose(out, ref, atol=5e-3, rtol=5e-3), (out, ref)

    print("KERNEL_OK")
</pallas_src>

<mosaic_0001>
module attributes {stable_mosaic.version = 11 : i64} {
  func.func @net_kernel(%arg0: i32, %arg1: memref<2x30x30xf32, #tpu.memory_space<vmem>>, %arg2: memref<3x30x84xf32, #tpu.memory_space<vmem>>, %arg3: memref<3x30x84xf32, #tpu.memory_space<vmem>>, %arg4: memref<1x84xf32, #tpu.memory_space<vmem>>, %arg5: memref<3x84x96xf32, #tpu.memory_space<vmem>>, %arg6: memref<3x84x96xf32, #tpu.memory_space<vmem>>, %arg7: memref<1x96xf32, #tpu.memory_space<vmem>>, %arg8: memref<576x128xf32, #tpu.memory_space<vmem>>, %arg9: memref<1x128xf32, #tpu.memory_space<vmem>>, %arg10: memref<128x64xf32, #tpu.memory_space<vmem>>, %arg11: memref<1x64xf32, #tpu.memory_space<vmem>>, %arg12: memref<1x64xf32, #tpu.memory_space<vmem>>, %arg13: memref<1x1xf32, #tpu.memory_space<vmem>>, %arg14: memref<2x1xf32, #tpu.memory_space<vmem>>, %arg15: memref<28x84xf32, #tpu.memory_space<vmem>>, %arg16: memref<12x96xf32, #tpu.memory_space<vmem>>, %arg17: memref<2x576xf32, #tpu.memory_space<vmem>>) attributes {dimension_semantics = [#tpu.dimension_semantics<parallel>], iteration_bounds = array<i64: 1>, scalar_prefetch = 0 : i64, scratch_operands = 3 : i64, tpu.core_type = #tpu.core_type<tc>, window_params = [{transform_indices = @transform_0, window_bounds = array<i64: 2, 30, 30>}, {pipeline_mode = #tpu.pipeline_mode<synchronous>, transform_indices = @transform_1, window_bounds = array<i64: 3, 30, 84>}, {pipeline_mode = #tpu.pipeline_mode<synchronous>, transform_indices = @transform_2, window_bounds = array<i64: 3, 30, 84>}, {pipeline_mode = #tpu.pipeline_mode<synchronous>, transform_indices = @transform_3, window_bounds = array<i64: 1, 84>}, {pipeline_mode = #tpu.pipeline_mode<synchronous>, transform_indices = @transform_4, window_bounds = array<i64: 3, 84, 96>}, {pipeline_mode = #tpu.pipeline_mode<synchronous>, transform_indices = @transform_5, window_bounds = array<i64: 3, 84, 96>}, {pipeline_mode = #tpu.pipeline_mode<synchronous>, transform_indices = @transform_6, window_bounds = array<i64: 1, 96>}, {pipeline_mode = #tpu.pipeline_mode<synchronous>, transform_indices = @transform_7, window_bounds = array<i64: 576, 128>}, {pipeline_mode = #tpu.pipeline_mode<synchronous>, transform_indices = @transform_8, window_bounds = array<i64: 1, 128>}, {pipeline_mode = #tpu.pipeline_mode<synchronous>, transform_indices = @transform_9, window_bounds = array<i64: 128, 64>}, {pipeline_mode = #tpu.pipeline_mode<synchronous>, transform_indices = @transform_10, window_bounds = array<i64: 1, 64>}, {pipeline_mode = #tpu.pipeline_mode<synchronous>, transform_indices = @transform_11, window_bounds = array<i64: 1, 64>}, {pipeline_mode = #tpu.pipeline_mode<synchronous>, transform_indices = @transform_12, window_bounds = array<i64: 1, 1>}, {transform_indices = @transform_13, window_bounds = array<i64: 2, 1>}]} {
    %c0 = arith.constant 0 : index
    %c0_0 = arith.constant 0 : index
    %0 = vector.load %arg4[%c0, %c0_0] : memref<1x84xf32, #tpu.memory_space<vmem>>, vector<1x84xf32>
    %c0_1 = arith.constant 0 : index
    %c0_2 = arith.constant 0 : index
    %1 = vector.load %arg7[%c0_1, %c0_2] : memref<1x96xf32, #tpu.memory_space<vmem>>, vector<1x96xf32>
    %c0_3 = arith.constant 0 : index
    %c0_4 = arith.constant 0 : index
    %c0_5 = arith.constant 0 : index
    %2 = vector.load %arg1[%c0_3, %c0_4, %c0_5] : memref<2x30x30xf32, #tpu.memory_space<vmem>>, vector<1x30x30xf32>
    %3 = vector.shape_cast %2 : vector<1x30x30xf32> to vector<30x30xf32>
    %4 = vector.extract_strided_slice %3 {offsets = [0, 0], sizes = [28, 30], strides = [1, 1]} : vector<30x30xf32> to vector<28x30xf32>
    %c0_6 = arith.constant 0 : index
    %c0_7 = arith.constant 0 : index
    %c0_8 = arith.constant 0 : index
    %5 = vector.load %arg2[%c0_6, %c0_7, %c0_8] : memref<3x30x84xf32, #tpu.memory_space<vmem>>, vector<1x30x84xf32>
    %6 = vector.shape_cast %5 : vector<1x30x84xf32> to vector<30x84xf32>
    %cst = arith.constant dense<0.000000e+00> : vector<28x84xf32>
    %7 = tpu.matmul %4, %6, %cst {dimension_numbers = #tpu.dot_dimension_numbers<[1], [0], [0], [1], [0, 0, 1, 1], [], []>} : vector<28x30xf32>, vector<30x84xf32>, vector<28x84xf32> -> vector<28x84xf32>
    %c0_9 = arith.constant 0 : index
    %c0_10 = arith.constant 0 : index
    %c0_11 = arith.constant 0 : index
    %8 = vector.load %arg3[%c0_9, %c0_10, %c0_11] : memref<3x30x84xf32, #tpu.memory_space<vmem>>, vector<1x30x84xf32>
    %9 = vector.shape_cast %8 : vector<1x30x84xf32> to vector<30x84xf32>
    %cst_12 = arith.constant dense<0.000000e+00> : vector<28x84xf32>
    %10 = tpu.matmul %4, %9, %cst_12 {dimension_numbers = #tpu.dot_dimension_numbers<[1], [0], [0], [1], [0, 0, 1, 1], [], []>} : vector<28x30xf32>, vector<30x84xf32>, vector<28x84xf32> -> vector<28x84xf32>
    %11 = vector.extract_strided_slice %3 {offsets = [1, 0], sizes = [28, 30], strides = [1, 1]} : vector<30x30xf32> to vector<28x30xf32>
    %c1 = arith.constant 1 : index
    %c0_13 = arith.constant 0 : index
    %c0_14 = arith.constant 0 : index
    %12 = vector.load %arg2[%c1, %c0_13, %c0_14] : memref<3x30x84xf32, #tpu.memory_space<vmem>>, vector<1x30x84xf32>
    %13 = vector.shape_cast %12 : vector<1x30x84xf32> to vector<30x84xf32>
    %cst_15 = arith.constant dense<0.000000e+00> : vector<28x84xf32>
    %14 = tpu.matmul %11, %13, %cst_15 {dimension_numbers = #tpu.dot_dimension_numbers<[1], [0], [0], [1], [0, 0, 1, 1], [], []>} : vector<28x30xf32>, vector<30x84xf32>, vector<28x84xf32> -> vector<28x84xf32>
    %15 = arith.addf %7, %14 : vector<28x84xf32>
    %c1_16 = arith.constant 1 : index
    %c0_17 = arith.constant 0 : index
    %c0_18 = arith.constant 0 : index
    %16 = vector.load %arg3[%c1_16, %c0_17, %c0_18] : memref<3x30x84xf32, #tpu.memory_space<vmem>>, vector<1x30x84xf32>
    %17 = vector.shape_cast %16 : vector<1x30x84xf32> to vector<30x84xf32>
    %cst_19 = arith.constant dense<0.000000e+00> : vector<28x84xf32>
    %18 = tpu.matmul %11, %17, %cst_19 {dimension_numbers = #tpu.dot_dimension_numbers<[1], [0], [0], [1], [0, 0, 1, 1], [], []>} : vector<28x30xf32>, vector<30x84xf32>, vector<28x84xf32> -> vector<28x84xf32>
    %19 = arith.addf %10, %18 : vector<28x84xf32>
    %20 = vector.extract_strided_slice %3 {offsets = [2, 0], sizes = [28, 30], strides = [1, 1]} : vector<30x30xf32> to vector<28x30xf32>
    %c2 = arith.constant 2 : index
    %c0_20 = arith.constant 0 : index
    %c0_21 = arith.constant 0 : index
    %21 = vector.load %arg2[%c2, %c0_20, %c0_21] : memref<3x30x84xf32, #tpu.memory_space<vmem>>, vector<1x30x84xf32>
    %22 = vector.shape_cast %21 : vector<1x30x84xf32> to vector<30x84xf32>
    %cst_22 = arith.constant dense<0.000000e+00> : vector<28x84xf32>
    %23 = tpu.matmul %20, %22, %cst_22 {dimension_numbers = #tpu.dot_dimension_numbers<[1], [0], [0], [1], [0, 0, 1, 1], [], []>} : vector<28x30xf32>, vector<30x84xf32>, vector<28x84xf32> -> vector<28x84xf32>
    %24 = arith.addf %15, %23 : vector<28x84xf32>
    %c2_23 = arith.constant 2 : index
    %c0_24 = arith.constant 0 : index
    %c0_25 = arith.constant 0 : index
    %25 = vector.load %arg3[%c2_23, %c0_24, %c0_25] : memref<3x30x84xf32, #tpu.memory_space<vmem>>, vector<1x30x84xf32>
    %26 = vector.shape_cast %25 : vector<1x30x84xf32> to vector<30x84xf32>
    %cst_26 = arith.constant dense<0.000000e+00> : vector<28x84xf32>
    %27 = tpu.matmul %20, %26, %cst_26 {dimension_numbers = #tpu.dot_dimension_numbers<[1], [0], [0], [1], [0, 0, 1, 1], [], []>} : vector<28x30xf32>, vector<30x84xf32>, vector<28x84xf32> -> vector<28x84xf32>
    %28 = arith.addf %19, %27 : vector<28x84xf32>
    %29 = arith.maximumf %24, %28 : vector<28x84xf32>
    %c0_27 = arith.constant 0 : index
    %c0_28 = arith.constant 0 : index
    %30 = vector.load %arg15[%c0_27, %c0_28] : memref<28x84xf32, #tpu.memory_space<vmem>>, vector<28x84xf32>
    tpu.vector_store %arg15[%c0_27, %c0_28], %29 {strides = array<i32>} : memref<28x84xf32, #tpu.memory_space<vmem>>, vector<28x84xf32>,
    %c0_29 = arith.constant 0 : index
    %c0_30 = arith.constant 0 : index
    %31 = tpu.strided_load %arg15[%c0_29, %c0_30] {strides = array<i32: 2, 1>} : memref<28x84xf32, #tpu.memory_space<vmem>>, vector<14x84xf32>
    %c1_31 = arith.constant 1 : index
    %c0_32 = arith.constant 0 : index
    %32 = tpu.strided_load %arg15[%c1_31, %c0_32] {strides = array<i32: 2, 1>} : memref<28x84xf32, #tpu.memory_space<vmem>>, vector<14x84xf32>
    %33 = arith.maximumf %31, %32 : vector<14x84xf32>
    %34 = vector.broadcast %0 : vector<1x84xf32> to vector<14x84xf32>
    %35 = arith.addf %33, %34 : vector<14x84xf32>
    %cst_33 = arith.constant 0.000000e+00 : f32
    %36 = vector.broadcast %cst_33 : f32 to vector<14x84xf32>
    %37 = arith.maximumf %35, %36 : vector<14x84xf32>
    %38 = vector.extract_strided_slice %37 {offsets = [0, 0], sizes = [12, 84], strides = [1, 1]} : vector<14x84xf32> to vector<12x84xf32>
    %c0_34 = arith.constant 0 : index
    %c0_35 = arith.constant 0 : index
    %c0_36 = arith.constant 0 : index
    %39 = vector.load %arg5[%c0_34, %c0_35, %c0_36] : memref<3x84x96xf32, #tpu.memory_space<vmem>>, vector<1x84x96xf32>
    %40 = vector.shape_cast %39 : vector<1x84x96xf32> to vector<84x96xf32>
    %cst_37 = arith.constant dense<0.000000e+00> : vector<12x96xf32>
    %41 = tpu.matmul %38, %40, %cst_37 {dimension_numbers = #tpu.dot_dimension_numbers<[1], [0], [0], [1], [0, 0, 1, 1], [], []>} : vector<12x84xf32>, vector<84x96xf32>, vector<12x96xf32> -> vector<12x96xf32>
    %c0_38 = arith.constant 0 : index
    %c0_39 = arith.constant 0 : index
    %c0_40 = arith.constant 0 : index
    %42 = vector.load %arg6[%c0_38, %c0_39, %c0_40] : memref<3x84x96xf32, #tpu.memory_space<vmem>>, vector<1x84x96xf32>
    %43 = vector.shape_cast %42 : vector<1x84x96xf32> to vector<84x96xf32>
    %cst_41 = arith.constant dense<0.000000e+00> : vector<12x96xf32>
    %44 = tpu.matmul %38, %43, %cst_41 {dimension_numbers = #tpu.dot_dimension_numbers<[1], [0], [0], [1], [0, 0, 1, 1], [], []>} : vector<12x84xf32>, vector<84x96xf32>, vector<12x96xf32> -> vector<12x96xf32>
    %45 = vector.extract_strided_slice %37 {offsets = [1, 0], sizes = [12, 84], strides = [1, 1]} : vector<14x84xf32> to vector<12x84xf32>
    %c1_42 = arith.constant 1 : index
    %c0_43 = arith.constant 0 : index
    %c0_44 = arith.constant 0 : index
    %46 = vector.load %arg5[%c1_42, %c0_43, %c0_44] : memref<3x84x96xf32, #tpu.memory_space<vmem>>, vector<1x84x96xf32>
    %47 = vector.shape_cast %46 : vector<1x84x96xf32> to vector<84x96xf32>
    %cst_45 = arith.constant dense<0.000000e+00> : vector<12x96xf32>
    %48 = tpu.matmul %45, %47, %cst_45 {dimension_numbers = #tpu.dot_dimension_numbers<[1], [0], [0], [1], [0, 0, 1, 1], [], []>} : vector<12x84xf32>, vector<84x96xf32>, vector<12x96xf32> -> vector<12x96xf32>
    %49 = arith.addf %41, %48 : vector<12x96xf32>
    %c1_46 = arith.constant 1 : index
    %c0_47 = arith.constant 0 : index
    %c0_48 = arith.constant 0 : index
    %50 = vector.load %arg6[%c1_46, %c0_47, %c0_48] : memref<3x84x96xf32, #tpu.memory_space<vmem>>, vector<1x84x96xf32>
    %51 = vector.shape_cast %50 : vector<1x84x96xf32> to vector<84x96xf32>
    %cst_49 = arith.constant dense<0.000000e+00> : vector<12x96xf32>
    %52 = tpu.matmul %45, %51, %cst_49 {dimension_numbers = #tpu.dot_dimension_numbers<[1], [0], [0], [1], [0, 0, 1, 1], [], []>} : vector<12x84xf32>, vector<84x96xf32>, vector<12x96xf32> -> vector<12x96xf32>
    %53 = arith.addf %44, %52 : vector<12x96xf32>
    %54 = vector.extract_strided_slice %37 {offsets = [2, 0], sizes = [12, 84], strides = [1, 1]} : vector<14x84xf32> to vector<12x84xf32>
    %c2_50 = arith.constant 2 : index
    %c0_51 = arith.constant 0 : index
    %c0_52 = arith.constant 0 : index
    %55 = vector.load %arg5[%c2_50, %c0_51, %c0_52] : memref<3x84x96xf32, #tpu.memory_space<vmem>>, vector<1x84x96xf32>
    %56 = vector.shape_cast %55 : vector<1x84x96xf32> to vector<84x96xf32>
    %cst_53 = arith.constant dense<0.000000e+00> : vector<12x96xf32>
    %57 = tpu.matmul %54, %56, %cst_53 {dimension_numbers = #tpu.dot_dimension_numbers<[1], [0], [0], [1], [0, 0, 1, 1], [], []>} : vector<12x84xf32>, vector<84x96xf32>, vector<12x96xf32> -> vector<12x96xf32>
    %58 = arith.addf %49, %57 : vector<12x96xf32>
    %c2_54 = arith.constant 2 : index
    %c0_55 = arith.constant 0 : index
    %c0_56 = arith.constant 0 : index
    %59 = vector.load %arg6[%c2_54, %c0_55, %c0_56] : memref<3x84x96xf32, #tpu.memory_space<vmem>>, vector<1x84x96xf32>
    %60 = vector.shape_cast %59 : vector<1x84x96xf32> to vector<84x96xf32>
    %cst_57 = arith.constant dense<0.000000e+00> : vector<12x96xf32>
    %61 = tpu.matmul %54, %60, %cst_57 {dimension_numbers = #tpu.dot_dimension_numbers<[1], [0], [0], [1], [0, 0, 1, 1], [], []>} : vector<12x84xf32>, vector<84x96xf32>, vector<12x96xf32> -> vector<12x96xf32>
    %62 = arith.addf %53, %61 : vector<12x96xf32>
    %63 = arith.maximumf %58, %62 : vector<12x96xf32>
    %c0_58 = arith.constant 0 : index
    %c0_59 = arith.constant 0 : index
    %64 = vector.load %arg16[%c0_58, %c0_59] : memref<12x96xf32, #tpu.memory_space<vmem>>, vector<12x96xf32>
    tpu.vector_store %arg16[%c0_58, %c0_59], %63 {strides = array<i32>} : memref<12x96xf32, #tpu.memory_space<vmem>>, vector<12x96xf32>,
    %c0_60 = arith.constant 0 : index
    %c0_61 = arith.constant 0 : index
    %65 = tpu.strided_load %arg16[%c0_60, %c0_61] {strides = array<i32: 2, 1>} : memref<12x96xf32, #tpu.memory_space<vmem>>, vector<6x96xf32>
    %c1_62 = arith.constant 1 : index
    %c0_63 = arith.constant 0 : index
    %66 = tpu.strided_load %arg16[%c1_62, %c0_63] {strides = array<i32: 2, 1>} : memref<12x96xf32, #tpu.memory_space<vmem>>, vector<6x96xf32>
    %67 = arith.maximumf %65, %66 : vector<6x96xf32>
    %68 = vector.broadcast %1 : vector<1x96xf32> to vector<6x96xf32>
    %69 = arith.addf %67, %68 : vector<6x96xf32>
    %cst_64 = arith.constant 0.000000e+00 : f32
    %70 = vector.broadcast %cst_64 : f32 to vector<6x96xf32>
    %71 = arith.maximumf %69, %70 : vector<6x96xf32>
    %72 = vector.extract_strided_slice %71 {offsets = [0, 0], sizes = [1, 96], strides = [1, 1]} : vector<6x96xf32> to vector<1x96xf32>
    %c0_65 = arith.constant 0 : index
    %c0_66 = arith.constant 0 : index
    %73 = vector.load %arg17[%c0_65, %c0_66] : memref<2x576xf32, #tpu.memory_space<vmem>>, vector<1x96xf32>
    tpu.vector_store %arg17[%c0_65, %c0_66], %72 {strides = array<i32>} : memref<2x576xf32, #tpu.memory_space<vmem>>, vector<1x96xf32>,
    %74 = vector.extract_strided_slice %71 {offsets = [1, 0], sizes = [1, 96], strides = [1, 1]} : vector<6x96xf32> to vector<1x96xf32>
    %c0_67 = arith.constant 0 : index
    %c96 = arith.constant 96 : index
    %75 = vector.load %arg17[%c0_67, %c96] : memref<2x576xf32, #tpu.memory_space<vmem>>, vector<1x96xf32>
    tpu.vector_store %arg17[%c0_67, %c96], %74 {strides = array<i32>} : memref<2x576xf32, #tpu.memory_space<vmem>>, vector<1x96xf32>,
    %76 = vector.extract_strided_slice %71 {offsets = [2, 0], sizes = [1, 96], strides = [1, 1]} : vector<6x96xf32> to vector<1x96xf32>
    %c0_68 = arith.constant 0 : index
    %c192 = arith.constant 192 : index
    %77 = vector.load %arg17[%c0_68, %c192] : memref<2x576xf32, #tpu.memory_space<vmem>>, vector<1x96xf32>
    tpu.vector_store %arg17[%c0_68, %c192], %76 {strides = array<i32>} : memref<2x576xf32, #tpu.memory_space<vmem>>, vector<1x96xf32>,
    %78 = vector.extract_strided_slice %71 {offsets = [3, 0], sizes = [1, 96], strides = [1, 1]} : vector<6x96xf32> to vector<1x96xf32>
    %c0_69 = arith.constant 0 : index
    %c288 = arith.constant 288 : index
    %79 = vector.load %arg17[%c0_69, %c288] : memref<2x576xf32, #tpu.memory_space<vmem>>, vector<1x96xf32>
    tpu.vector_store %arg17[%c0_69, %c288], %78 {strides = array<i32>} : memref<2x576xf32, #tpu.memory_space<vmem>>, vector<1x96xf32>,
    %80 = vector.extract_strided_slice %71 {offsets = [4, 0], sizes = [1, 96], strides = [1, 1]} : vector<6x96xf32> to vector<1x96xf32>
    %c0_70 = arith.constant 0 : index
    %c384 = arith.constant 384 : index
    %81 = vector.load %arg17[%c0_70, %c384] : memref<2x576xf32, #tpu.memory_space<vmem>>, vector<1x96xf32>
    tpu.vector_store %arg17[%c0_70, %c384], %80 {strides = array<i32>} : memref<2x576xf32, #tpu.memory_space<vmem>>, vector<1x96xf32>,
    %82 = vector.extract_strided_slice %71 {offsets = [5, 0], sizes = [1, 96], strides = [1, 1]} : vector<6x96xf32> to vector<1x96xf32>
    %c0_71 = arith.constant 0 : index
    %c480 = arith.constant 480 : index
    %83 = vector.load %arg17[%c0_71, %c480] : memref<2x576xf32, #tpu.memory_space<vmem>>, vector<1x96xf32>
    tpu.vector_store %arg17[%c0_71, %c480], %82 {strides = array<i32>} : memref<2x576xf32, #tpu.memory_space<vmem>>, vector<1x96xf32>,
    %c1_72 = arith.constant 1 : index
    %c0_73 = arith.constant 0 : index
    %c0_74 = arith.constant 0 : index
    %84 = vector.load %arg1[%c1_72, %c0_73, %c0_74] : memref<2x30x30xf32, #tpu.memory_space<vmem>>, vector<1x30x30xf32>
    %85 = vector.shape_cast %84 : vector<1x30x30xf32> to vector<30x30xf32>
    %86 = vector.extract_strided_slice %85 {offsets = [0, 0], sizes = [28, 30], strides = [1, 1]} : vector<30x30xf32> to vector<28x30xf32>
    %c0_75 = arith.constant 0 : index
    %c0_76 = arith.constant 0 : index
    %c0_77 = arith.constant 0 : index
    %87 = vector.load %arg2[%c0_75, %c0_76, %c0_77] : memref<3x30x84xf32, #tpu.memory_space<vmem>>, vector<1x30x84xf32>
    %88 = vector.shape_cast %87 : vector<1x30x84xf32> to vector<30x84xf32>
    %cst_78 = arith.constant dense<0.000000e+00> : vector<28x84xf32>
    %89 = tpu.matmul %86, %88, %cst_78 {dimension_numbers = #tpu.dot_dimension_numbers<[1], [0], [0], [1], [0, 0, 1, 1], [], []>} : vector<28x30xf32>, vector<30x84xf32>, vector<28x84xf32> -> vector<28x84xf32>
    %c0_79 = arith.constant 0 : index
    %c0_80 = arith.constant 0 : index
    %c0_81 = arith.constant 0 : index
    %90 = vector.load %arg3[%c0_79, %c0_80, %c0_81] : memref<3x30x84xf32, #tpu.memory_space<vmem>>, vector<1x30x84xf32>
    %91 = vector.shape_cast %90 : vector<1x30x84xf32> to vector<30x84xf32>
    %cst_82 = arith.constant dense<0.000000e+00> : vector<28x84xf32>
    %92 = tpu.matmul %86, %91, %cst_82 {dimension_numbers = #tpu.dot_dimension_numbers<[1], [0], [0], [1], [0, 0, 1, 1], [], []>} : vector<28x30xf32>, vector<30x84xf32>, vector<28x84xf32> -> vector<28x84xf32>
    %93 = vector.extract_strided_slice %85 {offsets = [1, 0], sizes = [28, 30], strides = [1, 1]} : vector<30x30xf32> to vector<28x30xf32>
    %c1_83 = arith.constant 1 : index
    %c0_84 = arith.constant 0 : index
    %c0_85 = arith.constant 0 : index
    %94 = vector.load %arg2[%c1_83, %c0_84, %c0_85] : memref<3x30x84xf32, #tpu.memory_space<vmem>>, vector<1x30x84xf32>
    %95 = vector.shape_cast %94 : vector<1x30x84xf32> to vector<30x84xf32>
    %cst_86 = arith.constant dense<0.000000e+00> : vector<28x84xf32>
    %96 = tpu.matmul %93, %95, %cst_86 {dimension_numbers = #tpu.dot_dimension_numbers<[1], [0], [0], [1], [0, 0, 1, 1], [], []>} : vector<28x30xf32>, vector<30x84xf32>, vector<28x84xf32> -> vector<28x84xf32>
    %97 = arith.addf %89, %96 : vector<28x84xf32>
    %c1_87 = arith.constant 1 : index
    %c0_88 = arith.constant 0 : index
    %c0_89 = arith.constant 0 : index
    %98 = vector.load %arg3[%c1_87, %c0_88, %c0_89] : memref<3x30x84xf32, #tpu.memory_space<vmem>>, vector<1x30x84xf32>
    %99 = vector.shape_cast %98 : vector<1x30x84xf32> to vector<30x84xf32>
    %cst_90 = arith.constant dense<0.000000e+00> : vector<28x84xf32>
    %100 = tpu.matmul %93, %99, %cst_90 {dimension_numbers = #tpu.dot_dimension_numbers<[1], [0], [0], [1], [0, 0, 1, 1], [], []>} : vector<28x30xf32>, vector<30x84xf32>, vector<28x84xf32> -> vector<28x84xf32>
    %101 = arith.addf %92, %100 : vector<28x84xf32>
    %102 = vector.extract_strided_slice %85 {offsets = [2, 0], sizes = [28, 30], strides = [1, 1]} : vector<30x30xf32> to vector<28x30xf32>
    %c2_91 = arith.constant 2 : index
    %c0_92 = arith.constant 0 : index
    %c0_93 = arith.constant 0 : index
    %103 = vector.load %arg2[%c2_91, %c0_92, %c0_93] : memref<3x30x84xf32, #tpu.memory_space<vmem>>, vector<1x30x84xf32>
    %104 = vector.shape_cast %103 : vector<1x30x84xf32> to vector<30x84xf32>
    %cst_94 = arith.constant dense<0.000000e+00> : vector<28x84xf32>
    %105 = tpu.matmul %102, %104, %cst_94 {dimension_numbers = #tpu.dot_dimension_numbers<[1], [0], [0], [1], [0, 0, 1, 1], [], []>} : vector<28x30xf32>, vector<30x84xf32>, vector<28x84xf32> -> vector<28x84xf32>
    %106 = arith.addf %97, %105 : vector<28x84xf32>
    %c2_95 = arith.constant 2 : index
    %c0_96 = arith.constant 0 : index
    %c0_97 = arith.constant 0 : index
    %107 = vector.load %arg3[%c2_95, %c0_96, %c0_97] : memref<3x30x84xf32, #tpu.memory_space<vmem>>, vector<1x30x84xf32>
    %108 = vector.shape_cast %107 : vector<1x30x84xf32> to vector<30x84xf32>
    %cst_98 = arith.constant dense<0.000000e+00> : vector<28x84xf32>
    %109 = tpu.matmul %102, %108, %cst_98 {dimension_numbers = #tpu.dot_dimension_numbers<[1], [0], [0], [1], [0, 0, 1, 1], [], []>} : vector<28x30xf32>, vector<30x84xf32>, vector<28x84xf32> -> vector<28x84xf32>
    %110 = arith.addf %101, %109 : vector<28x84xf32>
    %111 = arith.maximumf %106, %110 : vector<28x84xf32>
    %c0_99 = arith.constant 0 : index
    %c0_100 = arith.constant 0 : index
    %112 = vector.load %arg15[%c0_99, %c0_100] : memref<28x84xf32, #tpu.memory_space<vmem>>, vector<28x84xf32>
    tpu.vector_store %arg15[%c0_99, %c0_100], %111 {strides = array<i32>} : memref<28x84xf32, #tpu.memory_space<vmem>>, vector<28x84xf32>,
    %c0_101 = arith.constant 0 : index
    %c0_102 = arith.constant 0 : index
    %113 = tpu.strided_load %arg15[%c0_101, %c0_102] {strides = array<i32: 2, 1>} : memref<28x84xf32, #tpu.memory_space<vmem>>, vector<14x84xf32>
    %c1_103 = arith.constant 1 : index
    %c0_104 = arith.constant 0 : index
    %114 = tpu.strided_load %arg15[%c1_103, %c0_104] {strides = array<i32: 2, 1>} : memref<28x84xf32, #tpu.memory_space<vmem>>, vector<14x84xf32>
    %115 = arith.maximumf %113, %114 : vector<14x84xf32>
    %116 = vector.broadcast %0 : vector<1x84xf32> to vector<14x84xf32>
    %117 = arith.addf %115, %116 : vector<14x84xf32>
    %cst_105 = arith.constant 0.000000e+00 : f32
    %118 = vector.broadcast %cst_105 : f32 to vector<14x84xf32>
    %119 = arith.maximumf %117, %118 : vector<14x84xf32>
    %120 = vector.extract_strided_slice %119 {offsets = [0, 0], sizes = [12, 84], strides = [1, 1]} : vector<14x84xf32> to vector<12x84xf32>
    %c0_106 = arith.constant 0 : index
    %c0_107 = arith.constant 0 : index
    %c0_108 = arith.constant 0 : index
    %121 = vector.load %arg5[%c0_106, %c0_107, %c0_108] : memref<3x84x96xf32, #tpu.memory_space<vmem>>, vector<1x84x96xf32>
    %122 = vector.shape_cast %121 : vector<1x84x96xf32> to vector<84x96xf32>
    %cst_109 = arith.constant dense<0.000000e+00> : vector<12x96xf32>
    %123 = tpu.matmul %120, %122, %cst_109 {dimension_numbers = #tpu.dot_dimension_numbers<[1], [0], [0], [1], [0, 0, 1, 1], [], []>} : vector<12x84xf32>, vector<84x96xf32>, vector<12x96xf32> -> vector<12x96xf32>
    %c0_110 = arith.constant 0 : index
    %c0_111 = arith.constant 0 : index
    %c0_112 = arith.constant 0 : index
    %124 = vector.load %arg6[%c0_110, %c0_111, %c0_112] : memref<3x84x96xf32, #tpu.memory_space<vmem>>, vector<1x84x96xf32>
    %125 = vector.shape_cast %124 : vector<1x84x96xf32> to vector<84x96xf32>
    %cst_113 = arith.constant dense<0.000000e+00> : vector<12x96xf32>
    %126 = tpu.matmul %120, %125, %cst_113 {dimension_numbers = #tpu.dot_dimension_numbers<[1], [0], [0], [1], [0, 0, 1, 1], [], []>} : vector<12x84xf32>, vector<84x96xf32>, vector<12x96xf32> -> vector<12x96xf32>
    %127 = vector.extract_strided_slice %119 {offsets = [1, 0], sizes = [12, 84], strides = [1, 1]} : vector<14x84xf32> to vector<12x84xf32>
    %c1_114 = arith.constant 1 : index
    %c0_115 = arith.constant 0 : index
    %c0_116 = arith.constant 0 : index
    %128 = vector.load %arg5[%c1_114, %c0_115, %c0_116] : memref<3x84x96xf32, #tpu.memory_space<vmem>>, vector<1x84x96xf32>
    %129 = vector.shape_cast %128 : vector<1x84x96xf32> to vector<84x96xf32>
    %cst_117 = arith.constant dense<0.000000e+00> : vector<12x96xf32>
    %130 = tpu.matmul %127, %129, %cst_117 {dimension_numbers = #tpu.dot_dimension_numbers<[1], [0], [0], [1], [0, 0, 1, 1], [], []>} : vector<12x84xf32>, vector<84x96xf32>, vector<12x96xf32> -> vector<12x96xf32>
    %131 = arith.addf %123, %130 : vector<12x96xf32>
    %c1_118 = arith.constant 1 : index
    %c0_119 = arith.constant 0 : index
    %c0_120 = arith.constant 0 : index
    %132 = vector.load %arg6[%c1_118, %c0_119, %c0_120] : memref<3x84x96xf32, #tpu.memory_space<vmem>>, vector<1x84x96xf32>
    %133 = vector.shape_cast %132 : vector<1x84x96xf32> to vector<84x96xf32>
    %cst_121 = arith.constant dense<0.000000e+00> : vector<12x96xf32>
    %134 = tpu.matmul %127, %133, %cst_121 {dimension_numbers = #tpu.dot_dimension_numbers<[1], [0], [0], [1], [0, 0, 1, 1], [], []>} : vector<12x84xf32>, vector<84x96xf32>, vector<12x96xf32> -> vector<12x96xf32>
    %135 = arith.addf %126, %134 : vector<12x96xf32>
    %136 = vector.extract_strided_slice %119 {offsets = [2, 0], sizes = [12, 84], strides = [1, 1]} : vector<14x84xf32> to vector<12x84xf32>
    %c2_122 = arith.constant 2 : index
    %c0_123 = arith.constant 0 : index
    %c0_124 = arith.constant 0 : index
    %137 = vector.load %arg5[%c2_122, %c0_123, %c0_124] : memref<3x84x96xf32, #tpu.memory_space<vmem>>, vector<1x84x96xf32>
    %138 = vector.shape_cast %137 : vector<1x84x96xf32> to vector<84x96xf32>
    %cst_125 = arith.constant dense<0.000000e+00> : vector<12x96xf32>
    %139 = tpu.matmul %136, %138, %cst_125 {dimension_numbers = #tpu.dot_dimension_numbers<[1], [0], [0], [1], [0, 0, 1, 1], [], []>} : vector<12x84xf32>, vector<84x96xf32>, vector<12x96xf32> -> vector<12x96xf32>
    %140 = arith.addf %131, %139 : vector<12x96xf32>
    %c2_126 = arith.constant 2 : index
    %c0_127 = arith.constant 0 : index
    %c0_128 = arith.constant 0 : index
    %141 = vector.load %arg6[%c2_126, %c0_127, %c0_128] : memref<3x84x96xf32, #tpu.memory_space<vmem>>, vector<1x84x96xf32>
    %142 = vector.shape_cast %141 : vector<1x84x96xf32> to vector<84x96xf32>
    %cst_129 = arith.constant dense<0.000000e+00> : vector<12x96xf32>
    %143 = tpu.matmul %136, %142, %cst_129 {dimension_numbers = #tpu.dot_dimension_numbers<[1], [0], [0], [1], [0, 0, 1, 1], [], []>} : vector<12x84xf32>, vector<84x96xf32>, vector<12x96xf32> -> vector<12x96xf32>
    %144 = arith.addf %135, %143 : vector<12x96xf32>
    %145 = arith.maximumf %140, %144 : vector<12x96xf32>
    %c0_130 = arith.constant 0 : index
    %c0_131 = arith.constant 0 : index
    %146 = vector.load %arg16[%c0_130, %c0_131] : memref<12x96xf32, #tpu.memory_space<vmem>>, vector<12x96xf32>
    tpu.vector_store %arg16[%c0_130, %c0_131], %145 {strides = array<i32>} : memref<12x96xf32, #tpu.memory_space<vmem>>, vector<12x96xf32>,
    %c0_132 = arith.constant 0 : index
    %c0_133 = arith.constant 0 : index
    %147 = tpu.strided_load %arg16[%c0_132, %c0_133] {strides = array<i32: 2, 1>} : memref<12x96xf32, #tpu.memory_space<vmem>>, vector<6x96xf32>
    %c1_134 = arith.constant 1 : index
    %c0_135 = arith.constant 0 : index
    %148 = tpu.strided_load %arg16[%c1_134, %c0_135] {strides = array<i32: 2, 1>} : memref<12x96xf32, #tpu.memory_space<vmem>>, vector<6x96xf32>
    %149 = arith.maximumf %147, %148 : vector<6x96xf32>
    %150 = vector.broadcast %1 : vector<1x96xf32> to vector<6x96xf32>
    %151 = arith.addf %149, %150 : vector<6x96xf32>
    %cst_136 = arith.constant 0.000000e+00 : f32
    %152 = vector.broadcast %cst_136 : f32 to vector<6x96xf32>
    %153 = arith.maximumf %151, %152 : vector<6x96xf32>
    %154 = vector.extract_strided_slice %153 {offsets = [0, 0], sizes = [1, 96], strides = [1, 1]} : vector<6x96xf32> to vector<1x96xf32>
    %c1_137 = arith.constant 1 : index
    %c0_138 = arith.constant 0 : index
    %155 = vector.load %arg17[%c1_137, %c0_138] : memref<2x576xf32, #tpu.memory_space<vmem>>, vector<1x96xf32>
    tpu.vector_store %arg17[%c1_137, %c0_138], %154 {strides = array<i32>} : memref<2x576xf32, #tpu.memory_space<vmem>>, vector<1x96xf32>,
    %156 = vector.extract_strided_slice %153 {offsets = [1, 0], sizes = [1, 96], strides = [1, 1]} : vector<6x96xf32> to vector<1x96xf32>
    %c1_139 = arith.constant 1 : index
    %c96_140 = arith.constant 96 : index
    %157 = vector.load %arg17[%c1_139, %c96_140] : memref<2x576xf32, #tpu.memory_space<vmem>>, vector<1x96xf32>
    tpu.vector_store %arg17[%c1_139, %c96_140], %156 {strides = array<i32>} : memref<2x576xf32, #tpu.memory_space<vmem>>, vector<1x96xf32>,
    %158 = vector.extract_strided_slice %153 {offsets = [2, 0], sizes = [1, 96], strides = [1, 1]} : vector<6x96xf32> to vector<1x96xf32>
    %c1_141 = arith.constant 1 : index
    %c192_142 = arith.constant 192 : index
    %159 = vector.load %arg17[%c1_141, %c192_142] : memref<2x576xf32, #tpu.memory_space<vmem>>, vector<1x96xf32>
    tpu.vector_store %arg17[%c1_141, %c192_142], %158 {strides = array<i32>} : memref<2x576xf32, #tpu.memory_space<vmem>>, vector<1x96xf32>,
    %160 = vector.extract_strided_slice %153 {offsets = [3, 0], sizes = [1, 96], strides = [1, 1]} : vector<6x96xf32> to vector<1x96xf32>
    %c1_143 = arith.constant 1 : index
    %c288_144 = arith.constant 288 : index
    %161 = vector.load %arg17[%c1_143, %c288_144] : memref<2x576xf32, #tpu.memory_space<vmem>>, vector<1x96xf32>
    tpu.vector_store %arg17[%c1_143, %c288_144], %160 {strides = array<i32>} : memref<2x576xf32, #tpu.memory_space<vmem>>, vector<1x96xf32>,
    %162 = vector.extract_strided_slice %153 {offsets = [4, 0], sizes = [1, 96], strides = [1, 1]} : vector<6x96xf32> to vector<1x96xf32>
    %c1_145 = arith.constant 1 : index
    %c384_146 = arith.constant 384 : index
    %163 = vector.load %arg17[%c1_145, %c384_146] : memref<2x576xf32, #tpu.memory_space<vmem>>, vector<1x96xf32>
    tpu.vector_store %arg17[%c1_145, %c384_146], %162 {strides = array<i32>} : memref<2x576xf32, #tpu.memory_space<vmem>>, vector<1x96xf32>,
    %164 = vector.extract_strided_slice %153 {offsets = [5, 0], sizes = [1, 96], strides = [1, 1]} : vector<6x96xf32> to vector<1x96xf32>
    %c1_147 = arith.constant 1 : index
    %c480_148 = arith.constant 480 : index
    %165 = vector.load %arg17[%c1_147, %c480_148] : memref<2x576xf32, #tpu.memory_space<vmem>>, vector<1x96xf32>
    tpu.vector_store %arg17[%c1_147, %c480_148], %164 {strides = array<i32>} : memref<2x576xf32, #tpu.memory_space<vmem>>, vector<1x96xf32>,
    %c0_149 = arith.constant 0 : index
    %c0_150 = arith.constant 0 : index
    %166 = vector.load %arg17[%c0_149, %c0_150] : memref<2x576xf32, #tpu.memory_space<vmem>>, vector<2x576xf32>
    %c0_151 = arith.constant 0 : index
    %c0_152 = arith.constant 0 : index
    %167 = vector.load %arg8[%c0_151, %c0_152] : memref<576x128xf32, #tpu.memory_space<vmem>>, vector<576x128xf32>
    %cst_153 = arith.constant dense<0.000000e+00> : vector<2x128xf32>
    %168 = tpu.matmul %166, %167, %cst_153 {dimension_numbers = #tpu.dot_dimension_numbers<[1], [0], [0], [1], [0, 0, 1, 1], [], []>} : vector<2x576xf32>, vector<576x128xf32>, vector<2x128xf32> -> vector<2x128xf32>
    %c0_154 = arith.constant 0 : index
    %c0_155 = arith.constant 0 : index
    %169 = vector.load %arg9[%c0_154, %c0_155] : memref<1x128xf32, #tpu.memory_space<vmem>>, vector<1x128xf32>
    %170 = vector.broadcast %169 : vector<1x128xf32> to vector<2x128xf32>
    %171 = arith.addf %168, %170 : vector<2x128xf32>
    %cst_156 = arith.constant 0.000000e+00 : f32
    %172 = vector.broadcast %cst_156 : f32 to vector<2x128xf32>
    %173 = arith.maximumf %171, %172 : vector<2x128xf32>
    %c0_157 = arith.constant 0 : index
    %c0_158 = arith.constant 0 : index
    %174 = vector.load %arg10[%c0_157, %c0_158] : memref<128x64xf32, #tpu.memory_space<vmem>>, vector<128x64xf32>
    %cst_159 = arith.constant dense<0.000000e+00> : vector<2x64xf32>
    %175 = tpu.matmul %173, %174, %cst_159 {dimension_numbers = #tpu.dot_dimension_numbers<[1], [0], [0], [1], [0, 0, 1, 1], [], []>} : vector<2x128xf32>, vector<128x64xf32>, vector<2x64xf32> -> vector<2x64xf32>
    %c0_160 = arith.constant 0 : index
    %c0_161 = arith.constant 0 : index
    %176 = vector.load %arg11[%c0_160, %c0_161] : memref<1x64xf32, #tpu.memory_space<vmem>>, vector<1x64xf32>
    %177 = vector.broadcast %176 : vector<1x64xf32> to vector<2x64xf32>
    %178 = arith.addf %175, %177 : vector<2x64xf32>
    %cst_162 = arith.constant 0.000000e+00 : f32
    %179 = vector.broadcast %cst_162 : f32 to vector<2x64xf32>
    %180 = arith.maximumf %178, %179 : vector<2x64xf32>
    %c0_163 = arith.constant 0 : index
    %c0_164 = arith.constant 0 : index
    %181 = vector.load %arg12[%c0_163, %c0_164] : memref<1x64xf32, #tpu.memory_space<vmem>>, vector<1x64xf32>
    %182 = vector.broadcast %181 : vector<1x64xf32> to vector<2x64xf32>
    %183 = arith.mulf %180, %182 : vector<2x64xf32>
    %cst_165 = arith.constant dense<0.000000e+00> : vector<2xf32>
    %184 = vector.multi_reduction <add>, %183, %cst_165 [1] : vector<2x64xf32> to vector<2xf32>
    %185 = vector.shape_cast %184 : vector<2xf32> to vector<2x1xf32>
    %c0_166 = arith.constant 0 : index
    %c0_167 = arith.constant 0 : index
    %186 = vector.load %arg13[%c0_166, %c0_167] : memref<1x1xf32, #tpu.memory_space<vmem>>, vector<1x1xf32>
    %187 = vector.broadcast %186 : vector<1x1xf32> to vector<2x1xf32>
    %188 = arith.addf %185, %187 : vector<2x1xf32>
    %cst_168 = arith.constant 0.000000e+00 : f32
    %189 = vector.broadcast %cst_168 : f32 to vector<2x1xf32>
    %190 = arith.subf %189, %188 : vector<2x1xf32>
    %191 = math.exp %190 : vector<2x1xf32>
    %cst_169 = arith.constant 1.000000e+00 : f32
    %192 = vector.broadcast %cst_169 : f32 to vector<2x1xf32>
    %193 = arith.addf %192, %191 : vector<2x1xf32>
    %cst_170 = arith.constant 1.000000e+00 : f32
    %194 = vector.broadcast %cst_170 : f32 to vector<2x1xf32>
    %195 = arith.divf %194, %193 : vector<2x1xf32>
    %c0_171 = arith.constant 0 : index
    %c0_172 = arith.constant 0 : index
    %196 = vector.load %arg14[%c0_171, %c0_172] : memref<2x1xf32, #tpu.memory_space<vmem>>, vector<2x1xf32>
    tpu.vector_store %arg14[%c0_171, %c0_172], %195 {strides = array<i32>} : memref<2x1xf32, #tpu.memory_space<vmem>>, vector<2x1xf32>,
    return
  }
  func.func @transform_0(%arg0: i32) -> (i32, i32, i32) {
    %c0_i32 = arith.constant 0 : i32
    %c0_i32_0 = arith.constant 0 : i32
    %c0_i32_1 = arith.constant 0 : i32
    return %arg0, %c0_i32, %c0_i32_0 : i32, i32, i32
  }
  func.func @transform_1(%arg0: i32) -> (i32, i32, i32) {
    %c0_i32 = arith.constant 0 : i32
    %c0_i32_0 = arith.constant 0 : i32
    %c0_i32_1 = arith.constant 0 : i32
    %c0_i32_2 = arith.constant 0 : i32
    return %c0_i32, %c0_i32_0, %c0_i32_1 : i32, i32, i32
  }
  func.func @transform_2(%arg0: i32) -> (i32, i32, i32) {
    %c0_i32 = arith.constant 0 : i32
    %c0_i32_0 = arith.constant 0 : i32
    %c0_i32_1 = arith.constant 0 : i32
    %c0_i32_2 = arith.constant 0 : i32
    return %c0_i32, %c0_i32_0, %c0_i32_1 : i32, i32, i32
  }
  func.func @transform_3(%arg0: i32) -> (i32, i32) {
    %c0_i32 = arith.constant 0 : i32
    %c0_i32_0 = arith.constant 0 : i32
    %c0_i32_1 = arith.constant 0 : i32
    return %c0_i32, %c0_i32_0 : i32, i32
  }
  func.func @transform_4(%arg0: i32) -> (i32, i32, i32) {
    %c0_i32 = arith.constant 0 : i32
    %c0_i32_0 = arith.constant 0 : i32
    %c0_i32_1 = arith.constant 0 : i32
    %c0_i32_2 = arith.constant 0 : i32
    return %c0_i32, %c0_i32_0, %c0_i32_1 : i32, i32, i32
  }
  func.func @transform_5(%arg0: i32) -> (i32, i32, i32) {
    %c0_i32 = arith.constant 0 : i32
    %c0_i32_0 = arith.constant 0 : i32
    %c0_i32_1 = arith.constant 0 : i32
    %c0_i32_2 = arith.constant 0 : i32
    return %c0_i32, %c0_i32_0, %c0_i32_1 : i32, i32, i32
  }
  func.func @transform_6(%arg0: i32) -> (i32, i32) {
    %c0_i32 = arith.constant 0 : i32
    %c0_i32_0 = arith.constant 0 : i32
    %c0_i32_1 = arith.constant 0 : i32
    return %c0_i32, %c0_i32_0 : i32, i32
  }
  func.func @transform_7(%arg0: i32) -> (i32, i32) {
    %c0_i32 = arith.constant 0 : i32
    %c0_i32_0 = arith.constant 0 : i32
    %c0_i32_1 = arith.constant 0 : i32
    return %c0_i32, %c0_i32_0 : i32, i32
  }
  func.func @transform_8(%arg0: i32) -> (i32, i32) {
    %c0_i32 = arith.constant 0 : i32
    %c0_i32_0 = arith.constant 0 : i32
    %c0_i32_1 = arith.constant 0 : i32
    return %c0_i32, %c0_i32_0 : i32, i32
  }
  func.func @transform_9(%arg0: i32) -> (i32, i32) {
    %c0_i32 = arith.constant 0 : i32
    %c0_i32_0 = arith.constant 0 : i32
    %c0_i32_1 = arith.constant 0 : i32
    return %c0_i32, %c0_i32_0 : i32, i32
  }
  func.func @transform_10(%arg0: i32) -> (i32, i32) {
    %c0_i32 = arith.constant 0 : i32
    %c0_i32_0 = arith.constant 0 : i32
    %c0_i32_1 = arith.constant 0 : i32
    return %c0_i32, %c0_i32_0 : i32, i32
  }
  func.func @transform_11(%arg0: i32) -> (i32, i32) {
    %c0_i32 = arith.constant 0 : i32
    %c0_i32_0 = arith.constant 0 : i32
    %c0_i32_1 = arith.constant 0 : i32
    return %c0_i32, %c0_i32_0 : i32, i32
  }
  func.func @transform_12(%arg0: i32) -> (i32, i32) {
    %c0_i32 = arith.constant 0 : i32
    %c0_i32_0 = arith.constant 0 : i32
    %c0_i32_1 = arith.constant 0 : i32
    return %c0_i32, %c0_i32_0 : i32, i32
  }
  func.func @transform_13(%arg0: i32) -> (i32, i32) {
    %c0_i32 = arith.constant 0 : i32
    %c0_i32_0 = arith.constant 0 : i32
    return %arg0, %c0_i32 : i32, i32
  }
}

</mosaic_0001>

<bundles_post_ra>
// kernel: forward_pallas.1
= control target key start
LH: loop header
LB: loop body
LE: loop exit
PB: predicated region body
PF: predicated region fallthrough
CT: control target
= control target key end

     0   :  { %s5632_s0 = inlined_call_operand.vmem [shape: f32[2,30,30], index: 0, kind: input, shape index: {}]   ;;  %s5633_s1 = inlined_call_operand.vmem [shape: f32[3,30,84], index: 1, kind: input, shape index: {}]   ;;  %s5634_s2 = inlined_call_operand.hbm [shape: f32[3,30,84], index: 2, kind: input, shape index: {}]   ;;  %s5635_s3 = inlined_call_operand.vmem [shape: f32[1,84], index: 3, kind: input, shape index: {}]   ;;  %s5636_s4 = inlined_call_operand.vmem [shape: f32[3,84,96], index: 4, kind: input, shape index: {}]   ;;  %s5637_s5 = inlined_call_operand.hbm [shape: f32[3,84,96], index: 5, kind: input, shape index: {}]   ;;  %s5638_s6 = inlined_call_operand.vmem [shape: f32[1,96], index: 6, kind: input, shape index: {}]   ;;  %s5639_s7 = inlined_call_operand.hbm [shape: f32[576,128], index: 7, kind: input, shape index: {}]   ;;  %s5640_s8 = inlined_call_operand.vmem [shape: f32[1,128], index: 8, kind: input, shape index: {}]   ;;  %s5641_s9 = inlined_call_operand.vmem [shape: f32[128,64], index: 9, kind: input, shape index: {}]   ;;  %s5642_s10 = inlined_call_operand.vmem [shape: f32[1,64], index: 10, kind: input, shape index: {}]   ;;  %s5643_s11 = inlined_call_operand.vmem [shape: f32[1,64], index: 11, kind: input, shape index: {}]   ;;  %s5644_s12 = inlined_call_operand.<no memory space> [shape: f32[1,1], index: 12, kind: input, shape index: {}]   ;;  %s5645_s13 = inlined_call_operand.vmem [shape: f32[2,1], index: 13, kind: output, shape index: {}]  }
   0x1   :  { %v18_v0 = vstv %s5644_s12 }
   0x2   :  { %19 = vst [vmem:[#allocation5] sm:$0x1] %v18_v0 }
   0x3   :  { %20 = vsyncpa [#allocation7], 0 }
   0x4   :  { %21 = vsyncpa [#allocation9], 0  ;;  %s4701_s27 = smov [#allocation8]   ;;  %s4702_s29 = smov [#allocation6]  }
   0x5   :  { %s47_s28 = sshll.u32 %s4701_s27, 4  ;;  %s31_s30 = sshll.u32 %s4702_s29, 4  ;;  %s48_s28 = int_to_ptr.vmem [resolvable:$true] %s47_s28  ;;  %s4787_s30 = int_to_ptr.vmem [resolvable:$true] %s31_s30 }
   0x6   :  { %s4631_s16 = scalar_lea.hbm %s5637_s5, 4224 }
   0x7   :  { %p4632_p0 = scmp.ne.s32.totalorder %s5637_s5, %s4631_s16  ;;  %p4635_p1 = scmp.lt.u32.totalorder %s4631_s16, %s5637_s5 }
   0x9   :  { %p4637_p2 = pnand %p4635_p1, %p4632_p0 }
   0xb   :  { %4640 = shalt.err (!%p4637_p2)
}
   0xc   :  { %s4641_s20 = scalar_lea.vmem %s48_s28, 4224  ;;  %p4646_p4 = scmp.lt.s32.totalorder %s48_s28, %s48_s28 }
   0xd   :  { %p4642_p3 = scmp.ne.s32.totalorder %s48_s28, %s4641_s20  ;;  %p4647_p5 = scmp.lt.s32.totalorder %s4641_s20, %s4641_s20 }
   0xf   :  { %p4648_p6 = por %p4647_p5, %p4646_p4 }
  0x11   :  { %p4649_p7 = pnand %p4648_p6, %p4642_p3 }
  0x13   :  { %4652 = shalt.err (!%p4649_p7)
}
  0x14   :  { %s4703_s21 = smov 128   ;;  %s4704_s22 = smov 8  }
  0x15   :  { %53 = dma.hbm_to_vmem [thread:$0]  %s5637_s5, 4224, %s48_s28, [#allocation9], %s4703_s21, %s4703_s21, %s4704_s22  }
  0x16   :  { %s4653_s27 = scalar_lea.hbm %s5634_s2, 1536 }
  0x17   :  { %p4654_p8 = scmp.ne.s32.totalorder %s5634_s2, %s4653_s27  ;;  %p4657_p9 = scmp.lt.u32.totalorder %s4653_s27, %s5634_s2 }
  0x19   :  { %p4659_p10 = pnand %p4657_p9, %p4654_p8 }
  0x1b   :  { %4662 = shalt.err (!%p4659_p10)
}
  0x1c   :  { %s4663_s17 = scalar_lea.vmem %s4787_s30, 1536  ;;  %p4668_p12 = scmp.lt.s32.totalorder %s4787_s30, %s4787_s30 }
  0x1d   :  { %p4664_p11 = scmp.ne.s32.totalorder %s4787_s30, %s4663_s17  ;;  %p4669_p13 = scmp.lt.s32.totalorder %s4663_s17, %s4663_s17 }
  0x1f   :  { %p4670_p0 = por %p4669_p13, %p4668_p12 }
  0x21   :  { %p4671_p1 = pnand %p4670_p0, %p4664_p11 }
  0x23   :  { %4674 = shalt.err (!%p4671_p1)
}
  0x24   :  { %37 = dma.hbm_to_vmem [thread:$0]  %s5634_s2, 1536, %s4787_s30, [#allocation7], %s4703_s21, %s4703_s21, %s4704_s22  }
  0x25   :  { %s4705_s18 = smov [#allocation10]   ;;  %s4675_s23 = scalar_lea.hbm %s5639_s7, 9216 }
  0x26   :  { %s61_s19 = sshll.u32 %s4705_s18, 4  ;;  %p4676_p2 = scmp.ne.s32.totalorder %s5639_s7, %s4675_s23  ;;  %s62_s19 = int_to_ptr.vmem [resolvable:$true] %s61_s19 }
  0x27   :  { %p4679_p3 = scmp.lt.u32.totalorder %s4675_s23, %s5639_s7 }
  0x29   :  { %p4681_p4 = pnand %p4679_p3, %p4676_p2 }
  0x2b   :  { %4684 = shalt.err (!%p4681_p4)
}
  0x2c   :  { %s4685_s29 = scalar_lea.vmem %s62_s19, 9216  ;;  %p4690_p6 = scmp.lt.s32.totalorder %s62_s19, %s62_s19 }
  0x2d   :  { %p4686_p5 = scmp.ne.s32.totalorder %s62_s19, %s4685_s29  ;;  %p4691_p7 = scmp.lt.s32.totalorder %s4685_s29, %s4685_s29 }
  0x2f   :  { %p4692_p8 = por %p4691_p7, %p4690_p6 }
  0x31   :  { %p4693_p9 = pnand %p4692_p8, %p4686_p5 }
  0x33   :  { %4696 = shalt.err (!%p4693_p9)
}
  0x34   :  { %67 = dma.hbm_to_vmem [thread:$0]  %s5639_s7, 9216, %s62_s19, [#allocation9], %s4703_s21, %s4703_s21, %s4704_s22  }
  0x35   :  { %4697 = dma.done.wait [#allocation7], 1536  }
  0x36   :  { %4698 = vsyncadd [#allocation7], 4294965760 }
  0x37   :  { %4699 = dma.done.wait [#allocation9], 13440  }
  0x38   :  { %4700 = vsyncadd [#allocation9], 4294953856  ;;  %vm127_vm0 = vcmask 1045504   ;;  %vm4706_vm1 = vmmov 1   ;;  %v3061_v2 = vld [vmem:[%s5633_s1 + $0x20] sm:$0xff]  ;;  %v3062_v3 = vld [vmem:[%s5633_s1 + $0x28] sm:$0xff] }
  0x39   :  { %vm4840_vm2 = vmpackc.low %vm127_vm0, %vm4706_vm1  ;;  %v4853_v4 = vld [vmem:[%s5633_s1 + $0x30] sm:$0xff]  ;;  %v4855_v5 = vpack.c.bf16 %v3062_v3, %v3061_v2  ;;  %v3064_v6 = vld [vmem:[%s5633_s1 + $0x38] sm:$0x3f]  ;;  %vm110_vm3 = vcmask 1046528   ;;  %vm118_vm4 = vcmask 244736   ;;  %vm774_vm5 = vcmask 1043456  }
  0x3a   :  { %v97_v7 = vld [vmem:[#allocation6] sm:$0xff]  ;;  %v98_v8 = vld [vmem:[#allocation6 + $0x8] sm:$0xff]  ;;  %v4109_v9 = vpack.c.bf16 %v3064_v6, %v4853_v4  ;;  %v4874_v13 = vld [vmem:[%s5632_s0 + $0x10] sm:$0xff]  ;;  %vm706_vm6 = vcmask 687104   ;;  %vm710_vm7 = vcmask 683008   ;;  %vm1298_vm8 = vcmask 781312  }
  0x3b   :  { %v4861_v10 = vpack.c.bf16 %v98_v8, %v97_v7  ;;  %v89_v11 = vld [vmem:[%s5632_s0] sm:$0xff]  ;;  %v4869_v12 = vld [vmem:[%s5632_s0 + $0x8] sm:$0xff]  ;;  %4106 = vmatprep.subr.bf16.mxu0 %v4855_v5  ;;  %v114_v19 = vrot.slane %v4874_v13, 1  ;;  %v100_v20 = vld [vmem:[#allocation6 + $0x18] sm:$0x3f]  ;;  %v501_v44 = vrot.slane %v4874_v13, 2 }
  0x3c   :  { %v111_v14 = vrot.slane %v89_v11, 1  ;;  %v112_v15 = vrot.slane %v4869_v12, 1  ;;  %v93_v16 = vld [vmem:[%s5633_s1] sm:$0xff]  ;;  %v94_v17 = vld [vmem:[%s5633_s1 + $0x8] sm:$0xff]  ;;  %3633 = vmatprep.mubr.msk.f32.mxu1 %vm118_vm4, %v89_v11  ;;  %4108 = vmatpush3.bf16.msra.mxu0 %v4855_v5  ;;  %v4893_v21 = vld [vmem:[%s5632_s0 + $0x18] sm:$0x3f] }
  0x3d   :  { %v4884_v18 = vld [vmem:[#allocation6 + $0x10] sm:$0xff]  ;;  %4136 = vmatprep.subr.bf16.mxu1 %v4861_v10  ;;  %4111 = vmatprep.subr.msk.bf16.mxu0 %vm4840_vm2, %v4109_v9  ;;  %v4899_v23 = vpack.c.bf16 %v94_v17, %v93_v16  ;;  %v4903_v25 = vrot.slane %v4893_v21, 1  ;;  %v606_v26 = vld [vmem:[#allocation6 + $0x40] sm:$0xff]  ;;  %v607_v27 = vld [vmem:[#allocation6 + $0x48] sm:$0xff]  ;;  %v498_v39 = vrot.slane %v89_v11, 2  ;;  %v499_v40 = vrot.slane %v4869_v12, 2 }
  0x3e   :  { %4138 = vmatpush3.bf16.msra.mxu1 %v4861_v10  ;;  %v113_v22 = vsel %vm110_vm3, %v111_v14, %v112_v15  ;;  %v4139_v24 = vpack.c.bf16 %v100_v20, %v4884_v18  ;;  %v4909_v28 = vld [vmem:[%s5633_s1 + $0x10] sm:$0xff]  ;;  %v96_v29 = vld [vmem:[%s5633_s1 + $0x18] sm:$0x3f]  ;;  %v4914_v30 = vpack.c.bf16 %v607_v27, %v606_v26  ;;  %v115_v31 = vsel %vm110_vm3, %v112_v15, %v114_v19  ;;  %v314_v37 = vld [vmem:[#allocation6 + $0x28] sm:$0xff]  ;;  %s4709_s28 = smov 96  }
  0x3f   :  { %3591 = vmatprep.mubr.msk.f32.mxu0 %vm118_vm4, %v113_v22  ;;  %v4921_v32 = vld [vmem:[#allocation6 + $0x50] sm:$0xff]  ;;  %v609_v33 = vld [vmem:[#allocation6 + $0x58] sm:$0x3f]  ;;  %v117_v34 = vsel %vm110_vm3, %v114_v19, %v4903_v25  ;;  %v4119_v35 = vpack.c.bf16 %v96_v29, %v4909_v28  ;;  %v313_v36 = vld [vmem:[#allocation6 + $0x20] sm:$0xff]  ;;  %v500_v45 = vsel %vm127_vm0, %v498_v39, %v499_v40  ;;  %v503_v46 = vrot.slane %v4893_v21, 2 }
  0x40   :  { %4141 = vmatprep.subr.msk.bf16.mxu1 %vm4840_vm2, %v4139_v24  ;;  %4114 = vmatpush3.bf16.msk.msra.mxu0 %vm4840_vm2, %v4109_v9  ;;  %v4159_v38 = vpack.c.bf16 %v609_v33, %v4921_v32  ;;  %v4939_v41 = vpack.c.bf16 %v314_v37, %v313_v36  ;;  %v4944_v42 = vld [vmem:[#allocation6 + $0x30] sm:$0xff]  ;;  %v316_v43 = vld [vmem:[#allocation6 + $0x38] sm:$0x3f]  ;;  %v502_v48 = vsel %vm127_vm0, %v499_v40, %v501_v44  ;;  %v3085_v49 = vld [vmem:[%s5633_s1 + $0x40] sm:$0xff]  ;;  %vm1296_vm9 = vcmask 785408  }
  0x41   :  { %4116 = vmatprep.subr.bf16.mxu0 %v4899_v23  ;;  %v4129_v47 = vpack.c.bf16 %v316_v43, %v4944_v42  ;;  %v3086_v50 = vld [vmem:[%s5633_s1 + $0x48] sm:$0xff]  ;;  %v504_v51 = vsel %vm127_vm0, %v501_v44, %v503_v46  ;;  %v4985_v53 = vld [vmem:[%s5633_s1 + $0x50] sm:$0xff]  ;;  %v3088_v54 = vld [vmem:[%s5633_s1 + $0x58] sm:$0x3f]  ;;  %vm1312_vm10 = vcmask 778240   ;;  %vm1329_vm11 = vcmask 1041152  }
  0x42   :  { %4144 = vmatpush3.bf16.msk.msra.mxu1 %vm4840_vm2, %v4139_v24  ;;  %v4979_v52 = vpack.c.bf16 %v3086_v50, %v3085_v49  ;;  %v4149_v55 = vpack.c.bf16 %v3088_v54, %v4985_v53  ;;  %v3100_v56 = vld [vmem:[%s5636_s4 + $0x58] sm:$0xff]  ;;  %v3101_v57 = vld [vmem:[%s5636_s4 + $0x60] sm:$0xff]  ;;  %v3102_v62 = vld [vmem:[%s5636_s4 + $0x68] sm:$0xff]  ;;  %vm1330_vm12 = vcmask 518146   ;;  %vm1340_vm13 = vcmask 1040896  }
  0x43   :  { %4156 = vmatprep.subr.bf16.mxu1 %v4914_v30  ;;  %3592 = vmatmul.mubr.msk.f32.vlgmr.msra.gmra.mrb[0].mxu0 %vm118_vm4, %v115_v31  ;;  %v936_v58 = vld [vmem:[#allocation8 + $0x58] sm:$0xff]  ;;  %v5017_v59 = vpack.c.bf16 %v3101_v57, %v3100_v56  ;;  %v937_v60 = vld [vmem:[#allocation8 + $0x60] sm:$0xff]  ;;  %v938_v0 = vld [vmem:[#allocation8 + $0x68] sm:$0xff]  ;;  %vm1341_vm14 = vcmask 256002   ;;  %vm1337_vm15 = vcmask 523264  }
  0x44   :  { %4118 = vmatpush3.bf16.msra.mxu0 %v4899_v23  ;;  %3594 = vmatprep.mubr.msk.f32.mxu0 %vm118_vm4, %v117_v34  ;;  %v5019_v61 = vpack.c.bf16 %v937_v60, %v936_v58  ;;  %v3103_v63 = vld [vmem:[%s5636_s4 + $0x70] sm:$0xff]  ;;  %v3104_v7 = vld [vmem:[%s5636_s4 + $0x78] sm:$0xff]  ;;  %v3105_v8 = vld [vmem:[%s5636_s4 + $0x80] sm:$0xff] }
  0x45   :  { %4121 = vmatprep.subr.msk.bf16.mxu0 %vm4840_vm2, %v4119_v35  ;;  %3634 = vmatmul.mubr.msk.f32.vlgmr.msra.gmra.mrb[0].mxu1 %vm118_vm4, %v4869_v12  ;;  %v5031_v2 = vpack.c.bf16 %v3103_v63, %v3102_v62  ;;  %v939_v3 = vld [vmem:[#allocation8 + $0x70] sm:$0xff]  ;;  %v940_v9 = vld [vmem:[#allocation8 + $0x78] sm:$0xff]  ;;  %v942_v17 = vld [vmem:[#allocation8 + $0x88] sm:$0xff] }
  0x46   :  { %4158 = vmatpush3.bf16.msra.mxu1 %v4914_v30  ;;  %3636 = vmatprep.mubr.msk.f32.mxu1 %vm118_vm4, %v4874_v13  ;;  %v5033_v6 = vpack.c.bf16 %v939_v3, %v938_v0  ;;  %v3107_v14 = vld [vmem:[%s5636_s4 + $0x90] sm:$0xff]  ;;  %v3108_v20 = vld [vmem:[%s5636_s4 + $0x98] sm:$0xff]  ;;  %v3110_v29 = vld [vmem:[%s5636_s4 + $0xa8] sm:$0xf] }
  0x47   :  { %3595 = vmatmul.mubr.msk.f32.gmra.mrb[2].mxu0 %vm118_vm4, %v4903_v25  ;;  %4161 = vmatprep.subr.msk.bf16.mxu1 %vm4840_vm2, %v4159_v38  ;;  %v943_v19 = vld [vmem:[#allocation8 + $0x90] sm:$0xff]  ;;  %v944_v24 = vld [vmem:[#allocation8 + $0x98] sm:$0xff]  ;;  %v731_v33 = vld [vmem:[%s5636_s4] sm:$0xff] }
  0x48   :  { %4124 = vmatpush3.bf16.msk.msra.mxu0 %vm4840_vm2, %v4119_v35  ;;  %3605 = vmatprep.mubr.msk.f32.mxu0 %vm118_vm4, %v89_v11  ;;  %v5045_v11 = vpack.c.bf16 %v3105_v8, %v3104_v7  ;;  %v742_v35 = vld [vmem:[#allocation8] sm:$0xff]  ;;  %v743_v37 = vld [vmem:[#allocation8 + $0x8] sm:$0xff]  ;;  %vm5522_vm1 = vmor %vm1341_vm14, %vm1340_vm13 }
  0x49   :  { %4126 = vmatprep.subr.bf16.mxu0 %v4939_v41  ;;  %3637 = vmatmul.mubr.msk.f32.gmra.mrb[2].mxu1 %vm118_vm4, %v4893_v21  ;;  %v5107_v3 = vld [vmem:[%s5635_s3] ss:$0 sm:$0xff]  ;;  %v3196_v1 = vld [vmem:[%s5636_s4 + $0xa8] sm:$0xf] }
  0x4a   :  { %4164 = vmatpush3.bf16.msk.msra.mxu1 %vm4840_vm2, %v4159_v38  ;;  %3661 = vmatprep.mubr.msk.f32.mxu1 %vm118_vm4, %v500_v45  ;;  %v5095_v38 = vpack.c.bf16 %v743_v37, %v742_v35  ;;  %v735_v37 = vld [vmem:[%s5636_s4 + $0x20] sm:$0xff] }
  0x4b   :  { %3606 = vmatmul.mubr.msk.f32.vlgmr.msra.gmra.mrb[0].mxu0 %vm118_vm4, %v4869_v12  ;;  %4206 = vmatprep.subr.bf16.mxu1 %v5019_v61  ;;  %v941_v12 = vld [vmem:[#allocation8 + $0x80] sm:$0xff] }
  0x4c   :  { %4128 = vmatpush3.bf16.msra.mxu0 %v4939_v41  ;;  %3608 = vmatprep.mubr.msk.f32.mxu0 %vm118_vm4, %v4874_v13  ;;  %v3106_v13 = vld [vmem:[%s5636_s4 + $0x88] sm:$0xff]  ;;  %v5053_v15 = vpack.c.bf16 %v941_v12, %v940_v9 }
  0x4d   :  { %4131 = vmatprep.subr.msk.bf16.mxu0 %vm4840_vm2, %v4129_v47  ;;  %3662 = vmatmul.mubr.msk.f32.vlgmr.msra.gmra.mrb[0].mxu1 %vm118_vm4, %v502_v48  ;;  %v5055_v16 = vpack.c.bf16 %v3107_v14, %v3106_v13 }
  0x4e   :  { %3664 = vmatprep.mubr.msk.f32.mxu1 %vm118_vm4, %v504_v51  ;;  %4208 = vmatpush3.bf16.msra.mxu1 %v5019_v61 }
  0x4f   :  { %3609 = vmatmul.mubr.msk.f32.gmra.mrb[2].mxu0 %vm118_vm4, %v4893_v21  ;;  %4210 = vmatprep.subr.bf16.mxu1 %v5033_v6  ;;  %v5061_v21 = vpack.c.bf16 %v943_v19, %v942_v17 }
  0x50   :  { %4134 = vmatpush3.bf16.msk.msra.mxu0 %vm4840_vm2, %v4129_v47  ;;  %3619 = vmatprep.mubr.msk.f32.mxu0 %vm118_vm4, %v113_v22  ;;  %v3109_v22 = vld [vmem:[%s5636_s4 + $0xa0] sm:$0xff] }
  0x51   :  { %4146 = vmatprep.subr.bf16.mxu0 %v4979_v52  ;;  %3665 = vmatmul.mubr.msk.f32.gmra.mrb[2].mxu1 %vm118_vm4, %v503_v46  ;;  %v5070_v26 = vpack.c.bf16 %v3109_v22, %v3108_v20 }
  0x52   :  { %4212 = vmatpush3.bf16.msra.mxu1 %v5033_v6 }
  0x53   :  { %3620 = vmatmul.mubr.msk.f32.vlgmr.msra.gmra.mrb[4].mxu0 %vm118_vm4, %v115_v31  ;;  %4214 = vmatprep.subr.bf16.mxu1 %v5053_v15  ;;  %v946_v31 = vld [vmem:[#allocation8 + $0xa8] sm:$0xf] }
  0x54   :  { %4148 = vmatpush3.bf16.msra.mxu0 %v4979_v52  ;;  %3622 = vmatprep.mubr.msk.f32.mxu0 %vm118_vm4, %v117_v34  ;;  %v732_v34 = vld [vmem:[%s5636_s4 + $0x8] sm:$0xff] }
  0x55   :  { %4151 = vmatprep.subr.msk.bf16.mxu0 %vm4840_vm2, %v4149_v55  ;;  %v5092_v36 = vpack.c.bf16 %v732_v34, %v731_v33  ;;  %v744_v33 = vld [vmem:[#allocation8 + $0x10] sm:$0xff]  ;;  %v745_v34 = vld [vmem:[#allocation8 + $0x18] sm:$0xff] }
  0x56   :  { %4216 = vmatpush3.bf16.msra.mxu1 %v5053_v15 }
  0x57   :  { %3623 = vmatmul.mubr.msk.f32.gmra.mrb[6].mxu0 %vm118_vm4, %v4903_v25  ;;  %v945_v25 = vld [vmem:[#allocation8 + $0xa0] sm:$0xff]  ;;  %4218 = vmatprep.subr.bf16.mxu1 %v5061_v21 }
  0x58   :  { %4154 = vmatpush3.bf16.msk.msra.mxu0 %vm4840_vm2, %v4149_v55  ;;  %3647 = vmatprep.mubr.msk.f32.mxu0 %vm118_vm4, %v500_v45  ;;  %v5073_v27 = vpack.c.bf16 %v945_v25, %v944_v24  ;;  %v733_v24 = vld [vmem:[%s5636_s4 + $0x10] sm:$0xff] }
  0x59   :  { %4166 = vmatprep.subr.bf16.mxu0 %v5017_v59 }
  0x5a   :  { %4220 = vmatpush3.bf16.msra.mxu1 %v5061_v21 }
  0x5b   :  { %3648 = vmatmul.mubr.msk.f32.vlgmr.msra.gmra.mrb[0].mxu0 %vm118_vm4, %v502_v48  ;;  %4222 = vmatprep.subr.bf16.mxu1 %v5073_v27 }
  0x5c   :  { %3650 = vmatprep.mubr.msk.f32.mxu0 %vm118_vm4, %v504_v51  ;;  %4168 = vmatpush3.bf16.msra.mxu0 %v5017_v59 }
  0x5d   :  { %4170 = vmatprep.subr.bf16.mxu0 %v5031_v2 }
  0x5e   :  { %4224 = vmatpush3.bf16.msra.mxu1 %v5073_v27 }
  0x5f   :  { %3651 = vmatmul.mubr.msk.f32.gmra.mrb[2].mxu0 %vm118_vm4, %v503_v46  ;;  %3737 = vmatprep.subr.msk.mxu1 %vm774_vm5, %v946_v31 }
  0x60   :  { %4172 = vmatpush3.bf16.msra.mxu0 %v5031_v2 }
  0x61   :  { %4174 = vmatprep.subr.bf16.mxu0 %v5045_v11 }
  0x62   :  { %3738 = vmatpush3.msk.msra.mxu1 %vm774_vm5, %v946_v31  ;;  %v734_v31 = vld [vmem:[%s5636_s4 + $0x18] sm:$0xff] }
  0x63   :  { %4226 = vmatprep.subr.bf16.mxu1 %v5095_v38 }
  0x64   :  { %4176 = vmatpush3.bf16.msra.mxu0 %v5045_v11 }
  0x65   :  { %4178 = vmatprep.subr.bf16.mxu0 %v5055_v16 }
  0x68   :  { %4180 = vmatpush3.bf16.msra.mxu0 %v5055_v16 }
  0x69   :  { %4182 = vmatprep.subr.bf16.mxu0 %v5070_v26 }
  0x6c   :  { %4184 = vmatpush3.bf16.msra.mxu0 %v5070_v26 }
  0x6d   :  { %3687 = vmatprep.subr.msk.mxu0 %vm774_vm5, %v3110_v29 }
  0x70   :  { %3688 = vmatpush3.msk.msra.mxu0 %vm774_vm5, %v3110_v29 }
  0x71   :  { %4186 = vmatprep.subr.bf16.mxu0 %v5092_v36 }
 0x120   :  { %v3663_v39 = vpop.f32.mrb[0].mxu1 }
 0x121   :  { %v679_v40 = vpop.f32.mrb[1].mxu1 }
 0x124   :  { %v3666_v43 = vpop.f32.mrb[2].mxu1 }
 0x125   :  { %v689_v44 = vpop.f32.mrb[3].mxu1 }
 0x126   :  { %v3621_v45 = vpop.f32.mrb[4].mxu0 }
 0x127   :  { %v4565_v46 = vadd.f32 %v3663_v39, %v3621_v45  ;;  %v386_v47 = vpop.f32.mrb[5].mxu0  ;;  %v5129_v39 = vpack.c.bf16 %v734_v31, %v733_v24  ;;  %v747_v45 = vld [vmem:[#allocation8 + $0x28] sm:$0xff] }
 0x128   :  { %v4566_v48 = vadd.f32 %v679_v40, %v386_v47  ;;  %v5131_v40 = vpack.c.bf16 %v745_v34, %v744_v33  ;;  %v1206_v31 = vld [vmem:[#allocation8 + $0xc8] sm:$0xff] }
 0x12a   :  { %v3624_v49 = vpop.f32.mrb[6].mxu0 }
 0x12b   :  { %v4567_v50 = vadd.f32 %v3666_v43, %v3624_v49  ;;  %v396_v51 = vpop.f32.mrb[7].mxu0  ;;  %v736_v43 = vld [vmem:[%s5636_s4 + $0x28] sm:$0xff]  ;;  %v738_v49 = vld [vmem:[%s5636_s4 + $0x38] sm:$0xff] }
 0x12c   :  { %v4568_v54 = vadd.f32 %v689_v44, %v396_v51  ;;  %v746_v44 = vld [vmem:[#allocation8 + $0x20] sm:$0xff]  ;;  %v749_v51 = vld [vmem:[#allocation8 + $0x38] sm:$0xff] }
 0x12d   :  { %v5146_v47 = vpack.c.bf16 %v747_v45, %v746_v44  ;;  %v1208_v44 = vld [vmem:[#allocation8 + $0xd8] sm:$0xff] }
 0x12e   :  { %v3649_v55 = vpop.f32.mrb[0].mxu0 }
 0x12f   :  { %v703_v56 = vmax.f32 %v3649_v55, %v4565_v46  ;;  %v582_v57 = vpop.f32.mrb[1].mxu0  ;;  %v5144_v46 = vpack.c.bf16 %v736_v43, %v735_v37  ;;  %v3127_v37 = vld [vmem:[%s5636_s4 + $0xd0] sm:$0xff]  ;;  %v3128_v43 = vld [vmem:[%s5636_s4 + $0xd8] sm:$0xff] }
 0x130   :  { %v702_v58 = vmax.f32 %v582_v57, %v4566_v48  ;;  %v737_v48 = vld [vmem:[%s5636_s4 + $0x30] sm:$0xff]  ;;  %v740_v57 = vld [vmem:[%s5636_s4 + $0x48] sm:$0xff]  ;;  %v5233_v45 = vpack.c.bf16 %v3128_v43, %v3127_v37 }
 0x131   :  { %708 = vst.msk [vmem:[#allocation2 + $0x8] sm:$0xff] %vm706_vm6, %v703_v56  ;;  %v739_v56 = vld [vmem:[%s5636_s4 + $0x40] sm:$0xff] }
 0x132   :  { %707 = vst.msk [vmem:[#allocation2] sm:$0xff] %vm706_vm6, %v702_v58  ;;  %v3652_v60 = vpop.f32.mrb[2].mxu0  ;;  %v750_v58 = vld [vmem:[#allocation8 + $0x40] sm:$0xff] }
 0x133   :  { %v705_v62 = vmax.f32 %v3652_v60, %v4567_v50  ;;  %v592_v63 = vpop.f32.mrb[3].mxu0  ;;  %v748_v50 = vld [vmem:[#allocation8 + $0x30] sm:$0xff]  ;;  %v751_v60 = vld [vmem:[#allocation8 + $0x48] sm:$0xff] }
 0x134   :  { %v704_v0 = vmax.f32 %v592_v63, %v4568_v54  ;;  %v5160_v54 = vpack.c.bf16 %v738_v49, %v737_v48  ;;  %v5162_v55 = vpack.c.bf16 %v749_v51, %v748_v50  ;;  %v5176_v63 = vpack.c.bf16 %v751_v60, %v750_v58  ;;  %v3129_v49 = vld [vmem:[%s5636_s4 + $0xe0] sm:$0xff]  ;;  %v3130_v50 = vld [vmem:[%s5636_s4 + $0xe8] sm:$0xff]  ;;  %v3131_v60 = vld [vmem:[%s5636_s4 + $0xf0] sm:$0xff] }
 0x135   :  { %711 = vst.msk [vmem:[#allocation2 + $0x18] sm:$0xf] %vm710_vm7, %v705_v62  ;;  %v5174_v62 = vpack.c.bf16 %v740_v57, %v739_v56  ;;  %v1209_v51 = vld [vmem:[#allocation8 + $0xe0] sm:$0xff]  ;;  %v1210_v56 = vld [vmem:[#allocation8 + $0xe8] sm:$0xff]  ;;  %v5248_v57 = vpack.c.bf16 %v3130_v50, %v3129_v49 }
 0x136   :  { %709 = vst.msk [vmem:[#allocation2 + $0x10] sm:$0xff] %vm706_vm6, %v704_v0  ;;  %v741_v0 = vld [vmem:[%s5636_s4 + $0x50] sm:$0xf]  ;;  %v5251_v58 = vpack.c.bf16 %v1210_v56, %v1209_v51 }
 0x139   :  { %v712_v7 = vld [vmem:[#allocation2] ss:$2 sm:$0xff]  ;;  %v716_v8 = vld [vmem:[#allocation2 + $0x1] ss:$2 sm:$0xff] }
 0x13a   :  { %v719_v9 = vmax.f32 %v712_v7, %v716_v8  ;;  %v752_v7 = vld [vmem:[#allocation8 + $0x50] sm:$0xf]  ;;  %v3123_v8 = vld [vmem:[%s5636_s4 + $0xb0] sm:$0xff] }
 0x13c   :  { %v727_v12 = vadd.f32 %v5107_v3, %v719_v9  ;;  %v3124_v9 = vld [vmem:[%s5636_s4 + $0xb8] sm:$0xff] }
 0x13d   :  { %v714_v13 = vld [vmem:[#allocation2 + $0x10] ss:$2 sm:$0x3f]  ;;  %v718_v14 = vld [vmem:[#allocation2 + $0x11] ss:$2 sm:$0x3f] }
 0x13e   :  { %v720_v17 = vmax.f32 %v714_v13, %v718_v14  ;;  %v5111_v20 = vmax.f32 %v727_v12, 0.0  ;;  %v1203_v12 = vld [vmem:[#allocation8 + $0xb0] sm:$0xff]  ;;  %v1204_v13 = vld [vmem:[#allocation8 + $0xb8] sm:$0xff]  ;;  %v3125_v14 = vld [vmem:[%s5636_s4 + $0xc0] sm:$0xff] }
 0x140   :  { %v728_v19 = vadd.f32 %v5107_v3, %v720_v17  ;;  %v767_v25 = vrot.slane %v5111_v20, 1  ;;  %v5198_v17 = vpack.c.bf16 %v3124_v9, %v3123_v8  ;;  %v1115_v33 = vrot.slane %v5111_v20, 2  ;;  %v1212_v8 = vld [vmem:[#allocation8 + $0xf8] sm:$0xff] }
 0x142   :  { %v5113_v22 = vmax.f32 %v728_v19, 0.0  ;;  %v5200_v19 = vpack.c.bf16 %v1204_v13, %v1203_v12  ;;  %v3133_v13 = vld [vmem:[%s5636_s4 + $0x100] sm:$0xf] }
 0x144   :  { %v768_v29 = vrot.slane %v5113_v22, 1  ;;  %v5203_v24 = vrot.slane %v5113_v22, 2 }
 0x146   :  { %v769_v35 = vsel %vm110_vm3, %v767_v25, %v768_v29  ;;  %v3126_v25 = vld [vmem:[%s5636_s4 + $0xc8] sm:$0xff] }
 0x147   :  { %3689 = vmatprep.mubr.msk.f32.mxu0 %vm706_vm6, %v769_v35  ;;  %3739 = vmatprep.mubr.msk.f32.mxu1 %vm706_vm6, %v769_v35  ;;  %v5215_v34 = vpack.c.bf16 %v3126_v25, %v3125_v14  ;;  %v1213_v14 = vld [vmem:[#allocation8 + $0x100] sm:$0xf]  ;;  %v5277_v25 = vld [vmem:[%s5632_s0 + $0x20] sm:$0xff] }
 0x148   :  { %3690 = vmatmul.mubr.msk.f32.vlgmr.msra.gmra.mrb[8].mxu0 %vm706_vm6, %v768_v29  ;;  %3740 = vmatmul.mubr.msk.f32.vlgmr.msra.gmra.mrb[4].mxu1 %vm706_vm6, %v768_v29  ;;  %v1205_v29 = vld [vmem:[#allocation8 + $0xc0] sm:$0xff]  ;;  %v1390_v37 = vrot.slane %v5277_v25, 1 }
 0x149   :  { %4188 = vmatpush3.bf16.msra.mxu0 %v5092_v36  ;;  %4228 = vmatpush3.bf16.msra.mxu1 %v5095_v38  ;;  %v5217_v35 = vpack.c.bf16 %v1206_v31, %v1205_v29  ;;  %v5282_v29 = vld [vmem:[%s5632_s0 + $0x28] sm:$0xff]  ;;  %v3151_v31 = vld [vmem:[%s5633_s1 + $0x38] sm:$0x3f] }
 0x14a   :  { %3714 = vmatprep.mubr.msk.f32.mxu0 %vm706_vm6, %v5111_v20  ;;  %3764 = vmatprep.mubr.msk.f32.mxu1 %vm706_vm6, %v5111_v20  ;;  %v1117_v20 = vsel %vm127_vm0, %v1115_v33, %v5203_v24  ;;  %v1592_v33 = vld [vmem:[#allocation6 + $0x38] sm:$0x3f]  ;;  %v1391_v43 = vrot.slane %v5282_v29, 1 }
 0x14b   :  { %4190 = vmatprep.subr.bf16.mxu0 %v5129_v39  ;;  %4230 = vmatprep.subr.bf16.mxu1 %v5131_v40 }
 0x14c   :  { %v1392_v49 = vsel %vm110_vm3, %v1390_v37, %v1391_v43 }
 0x14d   :  { %4192 = vmatpush3.bf16.msra.mxu0 %v5129_v39  ;;  %4232 = vmatpush3.bf16.msra.mxu1 %v5131_v40 }
 0x14e   :  { %4194 = vmatprep.subr.bf16.mxu0 %v5144_v46  ;;  %4234 = vmatprep.subr.bf16.mxu1 %v5146_v47 }
 0x151   :  { %4196 = vmatpush3.bf16.msra.mxu0 %v5144_v46  ;;  %4236 = vmatpush3.bf16.msra.mxu1 %v5146_v47 }
 0x152   :  { %4198 = vmatprep.subr.bf16.mxu0 %v5160_v54  ;;  %4238 = vmatprep.subr.bf16.mxu1 %v5162_v55 }
 0x155   :  { %4200 = vmatpush3.bf16.msra.mxu0 %v5160_v54  ;;  %4240 = vmatpush3.bf16.msra.mxu1 %v5162_v55 }
 0x156   :  { %4202 = vmatprep.subr.bf16.mxu0 %v5174_v62  ;;  %4242 = vmatprep.subr.bf16.mxu1 %v5176_v63 }
 0x159   :  { %4204 = vmatpush3.bf16.msra.mxu0 %v5174_v62  ;;  %4244 = vmatpush3.bf16.msra.mxu1 %v5176_v63 }
 0x15a   :  { %3712 = vmatprep.subr.msk.mxu0 %vm774_vm5, %v741_v0  ;;  %3762 = vmatprep.subr.msk.mxu1 %vm774_vm5, %v752_v7 }
 0x15d   :  { %3713 = vmatpush3.msk.msra.mxu0 %vm774_vm5, %v741_v0  ;;  %3763 = vmatpush3.msk.msra.mxu1 %vm774_vm5, %v752_v7  ;;  %v3132_v0 = vld [vmem:[%s5636_s4 + $0xf8] sm:$0xff]  ;;  %v1211_v7 = vld [vmem:[#allocation8 + $0xf0] sm:$0xff] }
 0x15e   :  { %3715 = vmatmul.mubr.msk.f32.vlgmr.msra.gmra.mrb[8].mxu0 %vm706_vm6, %v5113_v22  ;;  %3765 = vmatmul.mubr.msk.f32.vlgmr.msra.gmra.mrb[4].mxu1 %vm706_vm6, %v5113_v22  ;;  %v1207_v22 = vld [vmem:[#allocation8 + $0xd0] sm:$0xff]  ;;  %v5262_v9 = vpack.c.bf16 %v3132_v0, %v3131_v60  ;;  %v5265_v12 = vpack.c.bf16 %v1212_v8, %v1211_v7  ;;  %v1774_v0 = vrot.slane %v5282_v29, 2 }
 0x15f   :  { %4246 = vmatprep.subr.bf16.mxu0 %v5198_v17  ;;  %4266 = vmatprep.subr.bf16.mxu1 %v5200_v19  ;;  %v5237_v48 = vpack.c.bf16 %v1208_v44, %v1207_v22  ;;  %v5298_v22 = vld [vmem:[%s5632_s0 + $0x30] sm:$0xff]  ;;  %v4309_v44 = vpack.c.bf16 %v1592_v33, %v4944_v42 }
 0x160   :  { %4248 = vmatpush3.bf16.msra.mxu0 %v5198_v17  ;;  %3789 = vmatprep.mubr.msk.f32.mxu0 %vm706_vm6, %v1117_v20  ;;  %v1393_v50 = vrot.slane %v5298_v22, 1  ;;  %v1776_v8 = vrot.slane %v5298_v22, 2 }
 0x161   :  { %4268 = vmatpush3.bf16.msra.mxu1 %v5200_v19  ;;  %3814 = vmatprep.mubr.msk.f32.mxu1 %vm706_vm6, %v1117_v20  ;;  %v4289_v20 = vpack.c.bf16 %v3151_v31, %v4853_v4  ;;  %v3147_v4 = vld [vmem:[%s5632_s0 + $0x38] sm:$0x3f] }
 0x162   :  { %4250 = vmatprep.subr.bf16.mxu0 %v5215_v34  ;;  %4270 = vmatprep.subr.bf16.mxu1 %v5217_v35  ;;  %v1395_v42 = vrot.slane %v3147_v4, 1 }
 0x164   :  { %4252 = vmatpush3.bf16.msra.mxu0 %v5215_v34  ;;  %v1396_v51 = vsel %vm110_vm3, %v1393_v50, %v1395_v42 }
 0x165   :  { %4272 = vmatpush3.bf16.msra.mxu1 %v5217_v35  ;;  %4254 = vmatprep.subr.bf16.mxu0 %v5233_v45 }
 0x166   :  { %4274 = vmatprep.subr.bf16.mxu1 %v5237_v48 }
 0x168   :  { %4256 = vmatpush3.bf16.msra.mxu0 %v5233_v45 }
 0x169   :  { %4276 = vmatpush3.bf16.msra.mxu1 %v5237_v48  ;;  %4258 = vmatprep.subr.bf16.mxu0 %v5248_v57 }
 0x16a   :  { %4278 = vmatprep.subr.bf16.mxu1 %v5251_v58 }
 0x16c   :  { %4260 = vmatpush3.bf16.msra.mxu0 %v5248_v57 }
 0x16d   :  { %4280 = vmatpush3.bf16.msra.mxu1 %v5251_v58  ;;  %4262 = vmatprep.subr.bf16.mxu0 %v5262_v9 }
 0x16e   :  { %4282 = vmatprep.subr.bf16.mxu1 %v5265_v12 }
 0x170   :  { %4264 = vmatpush3.bf16.msra.mxu0 %v5262_v9 }
 0x171   :  { %4284 = vmatpush3.bf16.msra.mxu1 %v5265_v12  ;;  %3787 = vmatprep.subr.msk.mxu0 %vm774_vm5, %v3133_v13 }
 0x172   :  { %3812 = vmatprep.subr.msk.mxu1 %vm774_vm5, %v1213_v14 }
 0x174   :  { %3788 = vmatpush3.msk.msra.mxu0 %vm774_vm5, %v3133_v13  ;;  %v5429_v13 = vld [vmem:[%s5638_s6] ss:$0 sm:$0xff]  ;;  %s4708_s6 = smov 64  }
 0x175   :  { %3813 = vmatpush3.msk.msra.mxu1 %vm774_vm5, %v1213_v14  ;;  %3790 = vmatmul.mubr.msk.f32.vlgmr.msra.gmra.mrb[8].mxu0 %vm706_vm6, %v5203_v24 }
 0x176   :  { %3815 = vmatmul.mubr.msk.f32.vlgmr.msra.gmra.mrb[4].mxu1 %vm706_vm6, %v5203_v24  ;;  %4286 = vmatprep.subr.bf16.mxu0 %v4855_v5  ;;  %v1377_v24 = vld [vmem:[%s5633_s1 + $0x18] sm:$0x3f] }
 0x177   :  { %4306 = vmatprep.subr.bf16.mxu1 %v4939_v41  ;;  %4288 = vmatpush3.bf16.msra.mxu0 %v4855_v5  ;;  %v1394_v5 = vsel %vm110_vm3, %v1391_v43, %v1393_v50  ;;  %v4299_v56 = vpack.c.bf16 %v1377_v24, %v4909_v28  ;;  %v1773_v28 = vrot.slane %v5277_v25, 2 }
 0x178   :  { %4308 = vmatpush3.bf16.msra.mxu1 %v4939_v41  ;;  %4291 = vmatprep.subr.msk.bf16.mxu0 %vm4840_vm2, %v4289_v20  ;;  %v1381_v41 = vld [vmem:[#allocation6 + $0x18] sm:$0x3f] }
 0x179   :  { %4311 = vmatprep.subr.msk.bf16.mxu1 %vm4840_vm2, %v4309_v44  ;;  %3825 = vmatprep.mubr.msk.f32.mxu0 %vm118_vm4, %v1392_v49  ;;  %v4319_v60 = vpack.c.bf16 %v1381_v41, %v4884_v18  ;;  %v3175_v18 = vld [vmem:[%s5633_s1 + $0x58] sm:$0x3f] }
 0x17a   :  { %3853 = vmatprep.mubr.msk.f32.mxu1 %vm118_vm4, %v1392_v49 }
 0x17b   :  { %4294 = vmatpush3.bf16.msk.msra.mxu0 %vm4840_vm2, %v4289_v20 }
 0x17c   :  { %4314 = vmatpush3.bf16.msk.msra.mxu1 %vm4840_vm2, %v4309_v44  ;;  %4296 = vmatprep.subr.bf16.mxu0 %v4899_v23 }
 0x17d   :  { %4316 = vmatprep.subr.bf16.mxu1 %v4861_v10 }
 0x17e   :  { %3826 = vmatmul.mubr.msk.f32.vlgmr.msra.gmra.mrb[10].mxu0 %vm118_vm4, %v1394_v5 }
 0x17f   :  { %3854 = vmatmul.mubr.msk.f32.vlgmr.msra.gmra.mrb[6].mxu1 %vm118_vm4, %v1394_v5  ;;  %4298 = vmatpush3.bf16.msra.mxu0 %v4899_v23  ;;  %v4329_v23 = vpack.c.bf16 %v3175_v18, %v4985_v53  ;;  %v1778_v53 = vrot.slane %v3147_v4, 2 }
 0x180   :  { %4318 = vmatpush3.bf16.msra.mxu1 %v4861_v10  ;;  %3828 = vmatprep.mubr.msk.f32.mxu0 %vm118_vm4, %v1396_v51  ;;  %v1883_v10 = vld [vmem:[#allocation6 + $0x58] sm:$0x3f] }
 0x181   :  { %3856 = vmatprep.mubr.msk.f32.mxu1 %vm118_vm4, %v1396_v51  ;;  %4301 = vmatprep.subr.msk.bf16.mxu0 %vm4840_vm2, %v4299_v56  ;;  %v4339_v7 = vpack.c.bf16 %v1883_v10, %v4921_v32  ;;  %v1775_v32 = vsel %vm127_vm0, %v1773_v28, %v1774_v0 }
 0x182   :  { %3829 = vmatmul.mubr.msk.f32.gmra.mrb[12].mxu0 %vm118_vm4, %v1395_v42  ;;  %4321 = vmatprep.subr.msk.bf16.mxu1 %vm4840_vm2, %v4319_v60 }
 0x183   :  { %3857 = vmatmul.mubr.msk.f32.gmra.mrb[8].mxu1 %vm118_vm4, %v1395_v42  ;;  %4304 = vmatpush3.bf16.msk.msra.mxu0 %vm4840_vm2, %v4299_v56 }
 0x184   :  { %4324 = vmatpush3.bf16.msk.msra.mxu1 %vm4840_vm2, %v4319_v60  ;;  %3839 = vmatprep.mubr.msk.f32.mxu0 %vm118_vm4, %v5277_v25 }
 0x185   :  { %3867 = vmatprep.mubr.msk.f32.mxu1 %vm118_vm4, %v5277_v25  ;;  %4326 = vmatprep.subr.bf16.mxu0 %v4979_v52 }
 0x186   :  { %3840 = vmatmul.mubr.msk.f32.vlgmr.msra.gmra.mrb[10].mxu0 %vm118_vm4, %v5282_v29  ;;  %4336 = vmatprep.subr.bf16.mxu1 %v4914_v30 }
 0x187   :  { %3868 = vmatmul.mubr.msk.f32.vlgmr.msra.gmra.mrb[6].mxu1 %vm118_vm4, %v5282_v29  ;;  %4328 = vmatpush3.bf16.msra.mxu0 %v4979_v52  ;;  %v1779_v52 = vsel %vm127_vm0, %v1776_v8, %v1778_v53 }
 0x188   :  { %4338 = vmatpush3.bf16.msra.mxu1 %v4914_v30  ;;  %3842 = vmatprep.mubr.msk.f32.mxu0 %vm118_vm4, %v5298_v22  ;;  %v1777_v30 = vsel %vm127_vm0, %v1774_v0, %v1776_v8 }
 0x189   :  { %3870 = vmatprep.mubr.msk.f32.mxu1 %vm118_vm4, %v5298_v22  ;;  %4331 = vmatprep.subr.msk.bf16.mxu0 %vm4840_vm2, %v4329_v23 }
 0x18a   :  { %3843 = vmatmul.mubr.msk.f32.gmra.mrb[12].mxu0 %vm118_vm4, %v3147_v4  ;;  %4341 = vmatprep.subr.msk.bf16.mxu1 %vm4840_vm2, %v4339_v7 }
 0x18b   :  { %3871 = vmatmul.mubr.msk.f32.gmra.mrb[8].mxu1 %vm118_vm4, %v3147_v4  ;;  %4334 = vmatpush3.bf16.msk.msra.mxu0 %vm4840_vm2, %v4329_v23 }
 0x18c   :  { %4344 = vmatpush3.bf16.msk.msra.mxu1 %vm4840_vm2, %v4339_v7  ;;  %3881 = vmatprep.mubr.msk.f32.mxu0 %vm118_vm4, %v1775_v32  ;;  %vm1349_vm2 = vcmask 1040640  }
 0x18d   :  { %3895 = vmatprep.mubr.msk.f32.mxu1 %vm118_vm4, %v1775_v32  ;;  %4346 = vmatprep.subr.bf16.mxu0 %v5017_v59 }
 0x18e   :  { %3882 = vmatmul.mubr.msk.f32.vlgmr.msra.gmra.mrb[10].mxu0 %vm118_vm4, %v1777_v30  ;;  %4386 = vmatprep.subr.bf16.mxu1 %v5019_v61 }
 0x18f   :  { %3896 = vmatmul.mubr.msk.f32.vlgmr.msra.gmra.mrb[6].mxu1 %vm118_vm4, %v1777_v30  ;;  %3884 = vmatprep.mubr.msk.f32.mxu0 %vm118_vm4, %v1779_v52 }
 0x190   :  { %3898 = vmatprep.mubr.msk.f32.mxu1 %vm118_vm4, %v1779_v52  ;;  %4348 = vmatpush3.bf16.msra.mxu0 %v5017_v59  ;;  %v2206_v59 = vld [vmem:[#allocation8 + $0xa8] sm:$0xf] }
 0x191   :  { %4388 = vmatpush3.bf16.msra.mxu1 %v5019_v61  ;;  %4350 = vmatprep.subr.bf16.mxu0 %v5031_v2 }
 0x192   :  { %3885 = vmatmul.mubr.msk.f32.gmra.mrb[12].mxu0 %vm118_vm4, %v1778_v53  ;;  %4390 = vmatprep.subr.bf16.mxu1 %v5033_v6 }
 0x193   :  { %3899 = vmatmul.mubr.msk.f32.gmra.mrb[8].mxu1 %vm118_vm4, %v1778_v53  ;;  %vm3035_vm4 = vcmask 517120  }
 0x194   :  { %4352 = vmatpush3.bf16.msra.mxu0 %v5031_v2 }
 0x195   :  { %4392 = vmatpush3.bf16.msra.mxu1 %v5033_v6  ;;  %4354 = vmatprep.subr.bf16.mxu0 %v5045_v11 }
 0x196   :  { %4394 = vmatprep.subr.bf16.mxu1 %v5053_v15 }
 0x198   :  { %4356 = vmatpush3.bf16.msra.mxu0 %v5045_v11 }
 0x199   :  { %4396 = vmatpush3.bf16.msra.mxu1 %v5053_v15  ;;  %4358 = vmatprep.subr.bf16.mxu0 %v5055_v16 }
 0x19a   :  { %4398 = vmatprep.subr.bf16.mxu1 %v5061_v21 }
 0x19c   :  { %4360 = vmatpush3.bf16.msra.mxu0 %v5055_v16 }
 0x19d   :  { %4400 = vmatpush3.bf16.msra.mxu1 %v5061_v21  ;;  %4362 = vmatprep.subr.bf16.mxu0 %v5070_v26  ;;  %v4707_v21 = vmov 1983009808  }
 0x19e   :  { %4402 = vmatprep.subr.bf16.mxu1 %v5073_v27 }
 0x1a0   :  { %4364 = vmatpush3.bf16.msra.mxu0 %v5070_v26  ;;  %v1316_v26 = vunpack.c.l.s4 %v4707_v21 }
 0x1a1   :  { %4404 = vmatpush3.bf16.msra.mxu1 %v5073_v27  ;;  %3921 = vmatprep.subr.msk.mxu0 %vm774_vm5, %v3196_v1  ;;  %v1318_v27 = vlaneseq }
 0x1a2   :  { %3971 = vmatprep.subr.msk.mxu1 %vm774_vm5, %v2206_v59  ;;  %v1317_v14 = vunpack.c.0.s8 %v1316_v26 }
 0x1a3   :  { %v1319_v25 = vshrl.u32 %v1318_v27, 7  ;;  %v2629_v27 = vld [vmem:[#allocation10 + $0x90] sm:$0xff] }
 0x1a4   :  { %3922 = vmatpush3.msk.msra.mxu0 %vm774_vm5, %v3196_v1 }
 0x1a5   :  { %3972 = vmatpush3.msk.msra.mxu1 %vm774_vm5, %v2206_v59  ;;  %4366 = vmatprep.subr.bf16.mxu0 %v5092_v36  ;;  %v5432_v43 = vsub.s32 %v1317_v14, %v1319_v25  ;;  %v2630_v14 = vld [vmem:[#allocation10 + $0x98] sm:$0xff]  ;;  %v2643_v25 = vld [vmem:[#allocation10 + $0x100] sm:$0xff] }
 0x1a6   :  { %4406 = vmatprep.subr.bf16.mxu1 %v5095_v38 }
 0x248   :  { %v3791_v61 = vpop.f32.mrb[8].mxu0 }
 0x249   :  { %v3816_v2 = vpop.f32.mrb[4].mxu1  ;;  %v1191_v6 = vpop.f32.mrb[9].mxu0 }
 0x24a   :  { %v1295_v11 = vmax.f32 %v3791_v61, %v3816_v2  ;;  %v1283_v15 = vpop.f32.mrb[5].mxu1 }
 0x24b   :  { %v1294_v16 = vmax.f32 %v1191_v6, %v1283_v15 }
 0x24c   :  { %1299 = vst.msk [vmem:[#allocation3 + $0x8] sm:$0xf] %vm1298_vm8, %v1295_v11 }
 0x24d   :  { %1297 = vst.msk [vmem:[#allocation3] sm:$0xff] %vm1296_vm9, %v1294_v16  ;;  %v2660_v16 = vld [vmem:[#allocation10 + $0x188] sm:$0xff] }
 0x254   :  { %v1300_v29 = vld [vmem:[#allocation3] ss:$2 sm:$0x3f]  ;;  %v1302_v31 = vld [vmem:[#allocation3 + $0x1] ss:$2 sm:$0x3f] }
 0x255   :  { %v1303_v33 = vmax.f32 %v1300_v29, %v1302_v31  ;;  %v4469_v29 = vpack.c.bf16 %v2630_v14, %v2629_v27  ;;  %v2644_v31 = vld [vmem:[#allocation10 + $0x108] sm:$0xff]  ;;  %v2637_v27 = vld [vmem:[#allocation10 + $0xd0] sm:$0xff]  ;;  %v2638_v14 = vld [vmem:[#allocation10 + $0xd8] sm:$0xff] }
 0x257   :  { %v1310_v37 = vadd.f32 %v5429_v13, %v1303_v33  ;;  %v2613_v33 = vld [vmem:[#allocation10 + $0x10] sm:$0xff] }
 0x259   :  { %v1311_v20 = vmax.f32 %v1310_v37, 0.0  ;;  %v2614_v37 = vld [vmem:[#allocation10 + $0x18] sm:$0xff] }
 0x25b   :  { %v1321_v22 = vrot.slane %v1311_v20, %v5432_v43  ;;  %1313 = vst.msk [vmem:[#allocation4] sm:$0x1] %vm1312_vm10, %v1311_v20  ;;  %v1351_v44 = vcombine.high %v1311_v20, %v1311_v20  ;;  %v4499_v20 = vpack.c.bf16 %v2644_v31, %v2643_v25  ;;  %v2651_v25 = vld [vmem:[#allocation10 + $0x140] sm:$0xff]  ;;  %v2652_v31 = vld [vmem:[#allocation10 + $0x148] sm:$0xff] }
 0x25d   :  { %v5436_v49 = vcombine.high %v1321_v22, %v1321_v22  ;;  %v3141_v4 = vrot.slane %v1321_v22, 9  ;;  %v5439_v50 = vrot.slane %v1351_v44, %v5432_v43  ;;  %v4471_v22 = vpack.c.bf16 %v2614_v37, %v2613_v33  ;;  %v2661_v44 = vld [vmem:[#allocation10 + $0x190] sm:$0xff]  ;;  %v2622_v37 = vld [vmem:[#allocation10 + $0x58] sm:$0xff] }
 0x25e   :  { %v2621_v33 = vld [vmem:[#allocation10 + $0x50] sm:$0xff] }
 0x25f   :  { %1334 = vrot.lane.b32.xlu1 %v5436_v49, %s4708_s6  ;;  %1324 = vrot.lane.b32.xlu0 %v3141_v4, %s4709_s28  ;;  %1360 = vst.msk [vmem:[#allocation4 + $0x6] sm:$0x1] %vm1312_vm10, %v5439_v50  ;;  %v2662_v4 = vld [vmem:[#allocation10 + $0x198] sm:$0xff] }
 0x261   :  { %v3883_v42 = vpop.f32.mrb[10].mxu0 }
 0x262   :  { %v3897_v24 = vpop.f32.mrb[6].mxu1  ;;  %v1857_v5 = vpop.f32.mrb[11].mxu0 }
 0x263   :  { %v1977_v41 = vmax.f32 %v3883_v42, %v3897_v24  ;;  %v1953_v51 = vpop.f32.mrb[7].mxu1  ;;  %v2631_v42 = vld [vmem:[#allocation10 + $0xa0] sm:$0xff]  ;;  %v4501_v24 = vpack.c.bf16 %v2662_v4, %v2661_v44  ;;  %v4487_v44 = vpack.c.bf16 %v2622_v37, %v2621_v33  ;;  %v2669_v4 = vld [vmem:[#allocation10 + $0x1d0] sm:$0xff]  ;;  %v2676_v33 = vld [vmem:[#allocation10 + $0x208] sm:$0xff] }
 0x264   :  { %v1976_v56 = vmax.f32 %v1857_v5, %v1953_v51  ;;  %v2632_v5 = vld [vmem:[#allocation10 + $0xa8] sm:$0xff]  ;;  %v2646_v51 = vld [vmem:[#allocation10 + $0x118] sm:$0xff] }
 0x265   :  { %1981 = vst.msk [vmem:[#allocation2 + $0x8] sm:$0xff] %vm706_vm6, %v1977_v41  ;;  %v3886_v60 = vpop.f32.mrb[12].mxu0  ;;  %v2645_v41 = vld [vmem:[#allocation10 + $0x110] sm:$0xff] }
 0x266   :  { %1980 = vst.msk [vmem:[#allocation2] sm:$0xff] %vm706_vm6, %v1976_v56  ;;  %v3900_v18 = vpop.f32.mrb[8].mxu1  ;;  %v1867_v10 = vpop.f32.mrb[13].mxu0  ;;  %v4473_v56 = vpack.c.bf16 %v2632_v5, %v2631_v42  ;;  %v2670_v42 = vld [vmem:[#allocation10 + $0x1d8] sm:$0xff] }
 0x267   :  { %v1979_v23 = vmax.f32 %v3886_v60, %v3900_v18  ;;  %v1963_v28 = vpop.f32.mrb[9].mxu1  ;;  %v4503_v60 = vpack.c.bf16 %v2646_v51, %v2645_v41  ;;  %v2615_v18 = vld [vmem:[#allocation10 + $0x20] sm:$0xff]  ;;  %v4517_v41 = vpack.c.bf16 %v2670_v42, %v2669_v4  ;;  %v2640_v51 = vld [vmem:[#allocation10 + $0xe8] sm:$0xff]  ;;  %v2677_v42 = vld [vmem:[#allocation10 + $0x210] sm:$0xff] }
 0x268   :  { %v1978_v0 = vmax.f32 %v1867_v10, %v1963_v28  ;;  %v2616_v10 = vld [vmem:[#allocation10 + $0x28] sm:$0xff] }
 0x269   :  { %1983 = vst.msk [vmem:[#allocation2 + $0x18] sm:$0xf] %vm710_vm7, %v1979_v23  ;;  %v2663_v23 = vld [vmem:[#allocation10 + $0x1a0] sm:$0xff]  ;;  %v2664_v28 = vld [vmem:[#allocation10 + $0x1a8] sm:$0xff] }
 0x26a   :  { %1982 = vst.msk [vmem:[#allocation2 + $0x10] sm:$0xff] %vm706_vm6, %v1978_v0  ;;  %v4475_v0 = vpack.c.bf16 %v2616_v10, %v2615_v18 }
 0x26d   :  { %v1984_v7 = vld [vmem:[#allocation2] ss:$2 sm:$0xff]  ;;  %v1986_v8 = vld [vmem:[#allocation2 + $0x1] ss:$2 sm:$0xff] }
 0x26e   :  { %v1988_v53 = vmax.f32 %v1984_v7, %v1986_v8  ;;  %v4505_v7 = vpack.c.bf16 %v2664_v28, %v2663_v23  ;;  %v2623_v23 = vld [vmem:[#allocation10 + $0x60] sm:$0xff]  ;;  %v2624_v28 = vld [vmem:[#allocation10 + $0x68] sm:$0xff] }
 0x270   :  { %v1990_v32 = vadd.f32 %v5107_v3, %v1988_v53 }
 0x271   :  { %v1985_v30 = vld [vmem:[#allocation2 + $0x10] ss:$2 sm:$0x3f]  ;;  %v1987_v52 = vld [vmem:[#allocation2 + $0x11] ss:$2 sm:$0x3f] }
 0x272   :  { %v1989_v1 = vmax.f32 %v1985_v30, %v1987_v52  ;;  %v1992_v61 = vmax.f32 %v1990_v32, 0.0 }
 0x274   :  { %v1991_v59 = vadd.f32 %v5107_v3, %v1989_v1  ;;  %v2029_v6 = vrot.slane %v1992_v61, 1 }
 0x276   :  { %v1993_v2 = vmax.f32 %v1991_v59, 0.0  ;;  %v2633_v59 = vld [vmem:[#allocation10 + $0xb0] sm:$0xff] }
 0x278   :  { %v2030_v11 = vrot.slane %v1993_v2, 1  ;;  %v2375_v3 = vrot.slane %v1993_v2, 2 }
 0x27a   :  { %v2031_v15 = vsel %vm110_vm3, %v2029_v6, %v2030_v11  ;;  %vm4712_vm3 = vmmov 0  }
 0x27b   :  { %3923 = vmatprep.mubr.msk.f32.mxu0 %vm706_vm6, %v2031_v15  ;;  %3973 = vmatprep.mubr.msk.f32.mxu1 %vm706_vm6, %v2031_v15  ;;  %v2617_v15 = vld [vmem:[#allocation10 + $0x30] sm:$0xff] }
 0x27c   :  { %3924 = vmatmul.mubr.msk.f32.vlgmr.msra.gmra.mrb[14].mxu0 %vm706_vm6, %v2030_v11  ;;  %3974 = vmatmul.mubr.msk.f32.vlgmr.msra.gmra.mrb[10].mxu1 %vm706_vm6, %v2030_v11  ;;  %v2648_v11 = vld [vmem:[#allocation10 + $0x128] sm:$0xff] }
 0x27d   :  { %4368 = vmatpush3.bf16.msra.mxu0 %v5092_v36  ;;  %4408 = vmatpush3.bf16.msra.mxu1 %v5095_v38  ;;  %v2004_v36 = vld [vmem:[%s5636_s4 + $0x50] sm:$0xf]  ;;  %v2015_v38 = vld [vmem:[#allocation8 + $0x50] sm:$0xf] }
 0x27e   :  { %3948 = vmatprep.mubr.msk.f32.mxu0 %vm706_vm6, %v1992_v61  ;;  %3998 = vmatprep.mubr.msk.f32.mxu1 %vm706_vm6, %v1992_v61 }
 0x27f   :  { %4370 = vmatprep.subr.bf16.mxu0 %v5129_v39  ;;  %4410 = vmatprep.subr.bf16.mxu1 %v5131_v40 }
 0x281   :  { %4372 = vmatpush3.bf16.msra.mxu0 %v5129_v39  ;;  %4412 = vmatpush3.bf16.msra.mxu1 %v5131_v40  ;;  %v2374_v39 = vrot.slane %v1992_v61, 2  ;;  %v2634_v61 = vld [vmem:[#allocation10 + $0xb8] sm:$0xff] }
 0x282   :  { %4374 = vmatprep.subr.bf16.mxu0 %v5144_v46  ;;  %4414 = vmatprep.subr.bf16.mxu1 %v5146_v47  ;;  %v4477_v6 = vpack.c.bf16 %v2634_v61, %v2633_v59 }
 0x283   :  { %v2376_v40 = vsel %vm127_vm0, %v2374_v39, %v2375_v3  ;;  %vm5518_vm0 = vmor %vm1330_vm12, %vm1329_vm11  ;;  %v2665_v39 = vld [vmem:[#allocation10 + $0x1b0] sm:$0xff] }
 0x285   :  { %4376 = vmatpush3.bf16.msra.mxu0 %v5144_v46  ;;  %4416 = vmatpush3.bf16.msra.mxu1 %v5146_v47  ;;  %v3219_v46 = vld [vmem:[%s5636_s4 + $0x100] sm:$0xf]  ;;  %v2471_v47 = vld [vmem:[#allocation8 + $0x100] sm:$0xf]  ;;  %s4711_s4 = smov 32  }
 0x286   :  { %4378 = vmatprep.subr.bf16.mxu0 %v5160_v54  ;;  %4418 = vmatprep.subr.bf16.mxu1 %v5162_v55 }
 0x289   :  { %4380 = vmatpush3.bf16.msra.mxu0 %v5160_v54  ;;  %4420 = vmatpush3.bf16.msra.mxu1 %v5162_v55 }
 0x28a   :  { %4382 = vmatprep.subr.bf16.mxu0 %v5174_v62  ;;  %4422 = vmatprep.subr.bf16.mxu1 %v5176_v63 }
 0x28d   :  { %4384 = vmatpush3.bf16.msra.mxu0 %v5174_v62  ;;  %4424 = vmatpush3.bf16.msra.mxu1 %v5176_v63 }
 0x28e   :  { %3946 = vmatprep.subr.msk.mxu0 %vm774_vm5, %v2004_v36  ;;  %3996 = vmatprep.subr.msk.mxu1 %vm774_vm5, %v2015_v38 }
 0x291   :  { %3947 = vmatpush3.msk.msra.mxu0 %vm774_vm5, %v2004_v36  ;;  %3997 = vmatpush3.msk.msra.mxu1 %vm774_vm5, %v2015_v38  ;;  %v2618_v36 = vld [vmem:[#allocation10 + $0x38] sm:$0xff] }
 0x292   :  { %3949 = vmatmul.mubr.msk.f32.vlgmr.msra.gmra.mrb[14].mxu0 %vm706_vm6, %v1993_v2  ;;  %3999 = vmatmul.mubr.msk.f32.vlgmr.msra.gmra.mrb[10].mxu1 %vm706_vm6, %v1993_v2  ;;  %v2647_v2 = vld [vmem:[#allocation10 + $0x120] sm:$0xff] }
 0x293   :  { %4426 = vmatprep.subr.bf16.mxu0 %v5198_v17  ;;  %4446 = vmatprep.subr.bf16.mxu1 %v5200_v19  ;;  %v4507_v38 = vpack.c.bf16 %v2648_v11, %v2647_v2  ;;  %v2655_v2 = vld [vmem:[#allocation10 + $0x160] sm:$0xff]  ;;  %v2625_v11 = vld [vmem:[#allocation10 + $0x70] sm:$0xff] }
 0x294   :  { %4428 = vmatpush3.bf16.msra.mxu0 %v5198_v17  ;;  %4023 = vmatprep.mubr.msk.f32.mxu0 %vm706_vm6, %v2376_v40 }
 0x295   :  { %4448 = vmatpush3.bf16.msra.mxu1 %v5200_v19  ;;  %4048 = vmatprep.mubr.msk.f32.mxu1 %vm706_vm6, %v2376_v40  ;;  %v2666_v40 = vld [vmem:[#allocation10 + $0x1b8] sm:$0xff] }
 0x296   :  { %4430 = vmatprep.subr.bf16.mxu0 %v5215_v34  ;;  %4450 = vmatprep.subr.bf16.mxu1 %v5217_v35 }
 0x298   :  { %4432 = vmatpush3.bf16.msra.mxu0 %v5215_v34 }
 0x299   :  { %4452 = vmatpush3.bf16.msra.mxu1 %v5217_v35  ;;  %4434 = vmatprep.subr.bf16.mxu0 %v5233_v45 }
 0x29a   :  { %4454 = vmatprep.subr.bf16.mxu1 %v5237_v48 }
 0x29c   :  { %4436 = vmatpush3.bf16.msra.mxu0 %v5233_v45  ;;  %v2627_v45 = vld [vmem:[#allocation10 + $0x80] sm:$0xff] }
 0x29d   :  { %4456 = vmatpush3.bf16.msra.mxu1 %v5237_v48  ;;  %4438 = vmatprep.subr.bf16.mxu0 %v5248_v57  ;;  %v2628_v48 = vld [vmem:[#allocation10 + $0x88] sm:$0xff] }
 0x29e   :  { %4458 = vmatprep.subr.bf16.mxu1 %v5251_v58 }
 0x2a0   :  { %4440 = vmatpush3.bf16.msra.mxu0 %v5248_v57  ;;  %v2611_v57 = vld [vmem:[#allocation10] sm:$0xff] }
 0x2a1   :  { %4460 = vmatpush3.bf16.msra.mxu1 %v5251_v58  ;;  %4442 = vmatprep.subr.bf16.mxu0 %v5262_v9  ;;  %v4465_v58 = vpack.c.bf16 %v2628_v48, %v2627_v45  ;;  %v2650_v45 = vld [vmem:[#allocation10 + $0x138] sm:$0xff]  ;;  %v2619_v48 = vld [vmem:[#allocation10 + $0x40] sm:$0xff] }
 0x2a2   :  { %4462 = vmatprep.subr.bf16.mxu1 %v5265_v12 }
 0x2a4   :  { %4444 = vmatpush3.bf16.msra.mxu0 %v5262_v9  ;;  %v2612_v9 = vld [vmem:[#allocation10 + $0x8] sm:$0xff] }
 0x2a5   :  { %4464 = vmatpush3.bf16.msra.mxu1 %v5265_v12  ;;  %4021 = vmatprep.subr.msk.mxu0 %vm774_vm5, %v3219_v46  ;;  %v2659_v12 = vld [vmem:[#allocation10 + $0x180] sm:$0xff]  ;;  %v4467_v21 = vpack.c.bf16 %v2612_v9, %v2611_v57  ;;  %v2620_v57 = vld [vmem:[#allocation10 + $0x48] sm:$0xff] }
 0x2a6   :  { %4046 = vmatprep.subr.msk.mxu1 %vm774_vm5, %v2471_v47  ;;  %v4497_v26 = vpack.c.bf16 %v2660_v16, %v2659_v12  ;;  %v4483_v9 = vpack.c.bf16 %v2620_v57, %v2619_v48  ;;  %v2667_v12 = vld [vmem:[#allocation10 + $0x1c0] sm:$0xff]  ;;  %v2668_v16 = vld [vmem:[#allocation10 + $0x1c8] sm:$0xff] }
 0x2a8   :  { %4022 = vmatpush3.msk.msra.mxu0 %vm774_vm5, %v3219_v46  ;;  %v4509_v46 = vpack.c.bf16 %v2666_v40, %v2665_v39 }
 0x2a9   :  { %4047 = vmatpush3.msk.msra.mxu1 %vm774_vm5, %v2471_v47  ;;  %4024 = vmatmul.mubr.msk.f32.vlgmr.msra.gmra.mrb[14].mxu0 %vm706_vm6, %v2375_v3  ;;  %v2635_v47 = vld [vmem:[#allocation10 + $0xc0] sm:$0xff]  ;;  %vm3053_vm5 = vcmask 1024  }
 0x2aa   :  { %4049 = vmatmul.mubr.msk.f32.vlgmr.msra.gmra.mrb[10].mxu1 %vm706_vm6, %v2375_v3  ;;  %4466 = vmatprep.subr.bf16.mxu0 %v4465_v58  ;;  %v4479_v3 = vpack.c.bf16 %v2618_v36, %v2617_v15  ;;  %v2626_v15 = vld [vmem:[#allocation10 + $0x78] sm:$0xff]  ;;  %v2673_v36 = vld [vmem:[#allocation10 + $0x1f0] sm:$0xff] }
 0x2ab   :  { %4468 = vmatpush3.bf16.msra.mxu0 %v4467_v21  ;;  %4498 = vmatprep.subr.bf16.mxu1 %v4497_v26  ;;  %v4513_v26 = vpack.c.bf16 %v2668_v16, %v2667_v12  ;;  %v4495_v39 = vpack.c.bf16 %v2626_v15, %v2625_v11  ;;  %v2943_v11 = vld [vmem:[%s5641_s9 + $0x50] sm:$0xff]  ;;  %v2944_v15 = vld [vmem:[%s5641_s9 + $0x58] sm:$0xff] }
 0x2ac   :  { %4470 = vmatprep.subr.bf16.mxu0 %v4469_v29  ;;  %4500 = vmatpush3.bf16.msra.mxu1 %v4499_v20  ;;  %v4485_v29 = vpack.c.bf16 %v2638_v14, %v2637_v27 }
 0x2ad   :  { %4502 = vmatprep.subr.bf16.mxu1 %v4501_v24  ;;  %v2639_v24 = vld [vmem:[#allocation10 + $0xe0] sm:$0xff] }
 0x2ae   :  { %v4489_v18 = vpack.c.bf16 %v2640_v51, %v2639_v24  ;;  %v2678_v24 = vld [vmem:[#allocation10 + $0x218] sm:$0xff] }
 0x2af   :  { %4472 = vmatpush3.bf16.msra.mxu0 %v4471_v22  ;;  %v4515_v22 = vpack.c.bf16 %v2652_v31, %v2651_v25  ;;  %v2675_v31 = vld [vmem:[#allocation10 + $0x200] sm:$0xff]  ;;  %v2936_v51 = vld [vmem:[%s5641_s9 + $0x18] sm:$0xff] }
 0x2b0   :  { %4474 = vmatprep.subr.bf16.mxu0 %v4473_v56  ;;  %4504 = vmatpush3.bf16.msra.mxu1 %v4503_v60  ;;  %v2653_v56 = vld [vmem:[#allocation10 + $0x150] sm:$0xff]  ;;  %v2654_v60 = vld [vmem:[#allocation10 + $0x158] sm:$0xff] }
 0x2b1   :  { %4506 = vmatprep.subr.bf16.mxu1 %v4505_v7  ;;  %v4519_v10 = vpack.c.bf16 %v2654_v60, %v2653_v56  ;;  %v4533_v56 = vpack.c.bf16 %v2678_v24, %v2677_v42  ;;  %v2680_v60 = vld [vmem:[#allocation10 + $0x228] sm:$0xff] }
 0x2b3   :  { %4476 = vmatpush3.bf16.msra.mxu0 %v4475_v0  ;;  %v2671_v0 = vld [vmem:[#allocation10 + $0x1e0] sm:$0xff] }
 0x2b4   :  { %4478 = vmatprep.subr.bf16.mxu0 %v4477_v6  ;;  %4508 = vmatpush3.bf16.msra.mxu1 %v4507_v38  ;;  %v2656_v6 = vld [vmem:[#allocation10 + $0x168] sm:$0xff]  ;;  %v2674_v38 = vld [vmem:[#allocation10 + $0x1f8] sm:$0xff] }
 0x2b5   :  { %4510 = vmatprep.subr.bf16.mxu1 %v4509_v46  ;;  %v3143_v46 = vrot.slane %v5439_v50, 9 }
 0x2b7   :  { %4480 = vmatpush3.bf16.msra.mxu0 %v4479_v3  ;;  %v4523_v3 = vpack.c.bf16 %v2656_v6, %v2655_v2  ;;  %v2942_v2 = vld [vmem:[%s5641_s9 + $0x48] sm:$0xff] }
 0x2d1   :  { %v1335_v54 = vpop.permute.xlu1 %1334  ;;  %v1325_v55 = vpop.permute.xlu0 %1324 }
 0x2d2   :  { %v1336_v62 = vrot.slane %v1335_v54, 6  ;;  %v1326_v17 = vrot.slane %v1325_v55, 6 }
 0x2d4   :  { %v1338_v34 = vsel %vm1337_vm15, %v1336_v62, %v1335_v54  ;;  %v1327_v35 = vsel %vm1296_vm9, %v1326_v17, %v1325_v55  ;;  %v2636_v54 = vld [vmem:[#allocation10 + $0xc8] sm:$0xff]  ;;  %v2649_v55 = vld [vmem:[#allocation10 + $0x130] sm:$0xff] }
 0x2d5   :  { %1332 = vst.msk [vmem:[#allocation4] sm:$0x5] %vm5518_vm0, %v1327_v35  ;;  %v4511_v58 = vpack.c.bf16 %v2650_v45, %v2649_v55  ;;  %v2658_v55 = vld [vmem:[#allocation10 + $0x178] sm:$0xff] }
 0x2d6   :  { %1343 = vst.msk [vmem:[#allocation4 + $0x2] sm:$0x5] %vm5522_vm1, %v1338_v34  ;;  %v4481_v34 = vpack.c.bf16 %v2636_v54, %v2635_v47  ;;  %v4525_v47 = vpack.c.bf16 %v2674_v38, %v2673_v36  ;;  %v2657_v54 = vld [vmem:[#allocation10 + $0x170] sm:$0xff]  ;;  %v4557_v36 = vpack.c.bf16 %v2944_v15, %v2943_v11  ;;  %v2945_v38 = vld [vmem:[%s5641_s9 + $0x60] sm:$0xff] }
 0x2d7   :  { %4512 = vmatpush3.bf16.msra.mxu1 %v4511_v58 }
 0x2d8   :  { %4482 = vmatprep.subr.bf16.mxu0 %v4481_v34  ;;  %4514 = vmatprep.subr.bf16.mxu1 %v4513_v26 }
 0x2d9   :  { %4484 = vmatpush3.bf16.msra.mxu0 %v4483_v9 }
 0x2da   :  { %4486 = vmatprep.subr.bf16.mxu0 %v4485_v29 }
 0x2db   :  { %4516 = vmatpush3.bf16.msra.mxu1 %v4515_v22  ;;  %v2934_v22 = vld [vmem:[%s5641_s9 + $0x8] sm:$0xff] }
 0x2dc   :  { %4518 = vmatprep.subr.bf16.mxu1 %v4517_v41  ;;  %v2935_v41 = vld [vmem:[%s5641_s9 + $0x10] sm:$0xff] }
 0x2dd   :  { %4488 = vmatpush3.bf16.msra.mxu0 %v4487_v44  ;;  %v4530_v44 = vpack.c.bf16 %v2676_v33, %v2675_v31  ;;  %v3234_v31 = vld [vmem:[#allocation5] ss:$0 sm:$0xff] }
 0x2de   :  { %4490 = vmatprep.subr.bf16.mxu0 %v4489_v18  ;;  %v4713_v18 = vmov 0.0  }
 0x2df   :  { %4520 = vmatpush3.bf16.msra.mxu1 %v4519_v10  ;;  %v4545_v10 = vpack.c.bf16 %v2936_v51, %v2935_v41 }
 0x37c   :  { %v4025_v8 = vpop.f32.mrb[14].mxu0 }
 0x37d   :  { %v4050_v53 = vpop.f32.mrb[10].mxu1  ;;  %v2450_v32 = vpop.f32.mrb[15].mxu0 }
 0x37e   :  { %v2553_v30 = vmax.f32 %v4025_v8, %v4050_v53  ;;  %v2541_v52 = vpop.f32.mrb[11].mxu1 }
 0x37f   :  { %v2552_v1 = vmax.f32 %v2450_v32, %v2541_v52  ;;  %v4491_v32 = vpack.c.bf16 %v2624_v28, %v2623_v23  ;;  %v2641_v52 = vld [vmem:[#allocation10 + $0xf0] sm:$0xff]  ;;  %v2937_v23 = vld [vmem:[%s5641_s9 + $0x20] sm:$0xff]  ;;  %v2938_v28 = vld [vmem:[%s5641_s9 + $0x28] sm:$0xff] }
 0x380   :  { %2555 = vst.msk [vmem:[#allocation3 + $0x8] sm:$0xf] %vm1298_vm8, %v2553_v30  ;;  %v2672_v30 = vld [vmem:[#allocation10 + $0x1e8] sm:$0xff] }
 0x381   :  { %2554 = vst.msk [vmem:[#allocation3] sm:$0xff] %vm1296_vm9, %v2552_v1  ;;  %v2642_v1 = vld [vmem:[#allocation10 + $0xf8] sm:$0xff]  ;;  %v4521_v59 = vpack.c.bf16 %v2672_v30, %v2671_v0  ;;  %4492 = vmatpush3.bf16.msra.mxu0 %v4491_v32 }
 0x382   :  { %v4493_v61 = vpack.c.bf16 %v2642_v1, %v2641_v52  ;;  %v2939_v52 = vld [vmem:[%s5641_s9 + $0x30] sm:$0xff]  ;;  %v2940_v1 = vld [vmem:[%s5641_s9 + $0x38] sm:$0xff] }
 0x383   :  { %4522 = vmatprep.subr.bf16.mxu1 %v4521_v59  ;;  %v4551_v59 = vpack.c.bf16 %v2940_v1, %v2939_v52 }
 0x384   :  { %4494 = vmatprep.subr.bf16.mxu0 %v4493_v61  ;;  %4524 = vmatpush3.bf16.msra.mxu1 %v4523_v3  ;;  %v2941_v61 = vld [vmem:[%s5641_s9 + $0x40] sm:$0xff]  ;;  %v2946_v3 = vld [vmem:[%s5641_s9 + $0x68] sm:$0xff] }
 0x385   :  { %4496 = vmatpush3.bf16.msra.mxu0 %v4495_v39  ;;  %4526 = vmatprep.subr.bf16.mxu1 %v4525_v47  ;;  %v4554_v6 = vpack.c.bf16 %v2942_v2, %v2941_v61  ;;  %v4560_v39 = vpack.c.bf16 %v2946_v3, %v2945_v38 }
 0x388   :  { %v2556_v62 = vld [vmem:[#allocation3] ss:$2 sm:$0x3f]  ;;  %v2557_v17 = vld [vmem:[#allocation3 + $0x1] ss:$2 sm:$0x3f] }
 0x389   :  { %v2558_v35 = vmax.f32 %v2556_v62, %v2557_v17  ;;  %v4527_v62 = vpack.c.bf16 %v2658_v55, %v2657_v54  ;;  %v3142_v17 = vrot.slane %v5436_v49, 9  ;;  %v3229_v55 = vld [vmem:[%s5640_s8] ss:$0 sm:$0xff] }
 0x38b   :  { %v2559_v21 = vadd.f32 %v5429_v13, %v2558_v35  ;;  %v4710_v35 = vmov 0.0|0.0   ;;  %4528 = vmatpush3.bf16.msra.mxu1 %v4527_v62 }
 0x38c   :  { %4529 = vmatprep.subr.bf16.mxu0 %v4710_v35  ;;  %4541 = vmatprep.subr.bf16.mxu1 %v4710_v35 }
 0x38d   :  { %v2560_v20 = vmax.f32 %v2559_v21, 0.0 }
 0x38f   :  { %v2569_v13 = vrot.slane %v2560_v20, %v5432_v43  ;;  %2561 = vst.msk [vmem:[#allocation4 + $0x1] sm:$0x1] %vm1312_vm10, %v2560_v20  ;;  %v2591_v5 = vcombine.high %v2560_v20, %v2560_v20  ;;  %v2933_v20 = vld [vmem:[%s5641_s9] sm:$0xff] }
 0x391   :  { %v2578_v7 = vcombine.high %v2569_v13, %v2569_v13  ;;  %v3226_v8 = vrot.slane %v2569_v13, 9  ;;  %v2598_v53 = vrot.slane %v2591_v5, %v5432_v43  ;;  %v4542_v5 = vpack.c.bf16 %v2934_v22, %v2933_v20 }
 0x393   :  { %2579 = vrot.lane.b32.xlu1 %v2578_v7, %s4708_s6  ;;  %2572 = vrot.lane.b32.xlu0 %v3226_v8, %s4709_s28  ;;  %2600 = vst.msk [vmem:[#allocation4 + $0x7] sm:$0x1] %vm1312_vm10, %v2598_v53  ;;  %v3228_v40 = vrot.slane %v2598_v53, 9  ;;  %v3227_v34 = vrot.slane %v2578_v7, 9  ;;  %v2681_v7 = vld [vmem:[#allocation10 + $0x230] sm:$0xff]  ;;  %v2682_v8 = vld [vmem:[#allocation10 + $0x238] sm:$0xff]  ;;  %v4548_v53 = vpack.c.bf16 %v2938_v28, %v2937_v23 }
 0x394   :  { %v4539_v32 = vpack.c.bf16 %v2682_v8, %v2681_v7 }
 0x397   :  { %2603 = vrot.lane.b32.xlu1 %v3228_v40, %s4709_s28  ;;  %1363 = vrot.lane.b32.xlu0 %v3143_v46, %s4709_s28  ;;  %v2947_v40 = vld [vmem:[%s5641_s9 + $0x70] sm:$0xff]  ;;  %v2948_v46 = vld [vmem:[%s5641_s9 + $0x78] sm:$0xff] }
 0x398   :  { %v4563_v47 = vpack.c.bf16 %v2948_v46, %v2947_v40 }
 0x39b   :  { %2587 = vrot.lane.b32.xlu1 %v3227_v34, %s4711_s4  ;;  %1346 = vrot.lane.b32.xlu0 %v3142_v17, %s4711_s4 }
 0x405   :  { %v2580_v50 = vpop.permute.xlu1 %2579  ;;  %v2573_v45 = vpop.permute.xlu0 %2572 }
 0x406   :  { %v2581_v48 = vrot.slane %v2580_v50, 6  ;;  %v2574_v57 = vrot.slane %v2573_v45, 6 }
 0x408   :  { %v2582_v58 = vsel %vm1337_vm15, %v2581_v48, %v2580_v50  ;;  %v2575_v9 = vsel %vm1296_vm9, %v2574_v57, %v2573_v45 }
 0x409   :  { %2577 = vst.msk [vmem:[#allocation4 + $0x1] sm:$0x5] %vm5518_vm0, %v2575_v9  ;;  %v2604_v49 = vpop.permute.xlu1 %2603  ;;  %v1364_v12 = vpop.permute.xlu0 %1363 }
 0x40a   :  { %v2605_v16 = vrot.slane %v2604_v49, 6  ;;  %v1365_v21 = vrot.slane %v1364_v12, 6  ;;  %2584 = vst.msk [vmem:[#allocation4 + $0x3] sm:$0x5] %vm5522_vm1, %v2582_v58 }
 0x40c   :  { %v2606_v26 = vsel %vm1296_vm9, %v2605_v16, %v2604_v49  ;;  %v1366_v27 = vsel %vm1296_vm9, %v1365_v21, %v1364_v12  ;;  %v3232_v12 = vld [vmem:[%s5642_s10] ss:$0 sm:$0xff] }
 0x40d   :  { %2608 = vst.msk [vmem:[#allocation4 + $0x7] sm:$0x5] %vm5518_vm0, %v2606_v26  ;;  %1368 = vst.msk [vmem:[#allocation4 + $0x6] sm:$0x5] %vm5518_vm0, %v1366_v27  ;;  %v2588_v14 = vpop.permute.xlu1 %2587  ;;  %v1347_v25 = vpop.permute.xlu0 %1346  ;;  %v3233_v27 = vld [vmem:[%s5643_s11] ss:$0 sm:$0xff] }
 0x40e   :  { %2590 = vst.msk [vmem:[#allocation4 + $0x5] sm:$0x1] %vm1349_vm2, %v2588_v14  ;;  %1350 = vst.msk [vmem:[#allocation4 + $0x4] sm:$0x1] %vm1349_vm2, %v1347_v25 }
 0x414   :  { %v3230_v30 = vld.sshfl [vmem:[#allocation4 + $0x8] sm:$0x3 pattern:$0x76325410] }
 0x415   :  { %v2609_v29 = vld [vmem:[#allocation4] sm:$0xff] }
 0x416   :  { %v2699_v19 = vrot.slane %v2609_v29, %v5432_v43  ;;  %v2692_v37 = vcombine.high %v2609_v29, %v2609_v29 }
 0x418   :  { %v2707_v63 = vcombine.high %v2699_v19, %v2699_v19  ;;  %v2706_v4 = vrot.slane %v2692_v37, %v5432_v43  ;;  %v2679_v43 = vld [vmem:[#allocation10 + $0x220] sm:$0xff] }
 0x419   :  { %v4536_v0 = vpack.c.bf16 %v2680_v60, %v2679_v43 }
 0x41a   :  { %2786 = vmatprep.mubr.f32.mxu0 %v2707_v63  ;;  %v2708_v13 = vcombine.high %v2706_v4, %v2706_v4 }
 0x41b   :  { %2787 = vmatmul.mubr.f32.vlgmr.msra.gmra.mrb[16].mxu0 %v2699_v19 }
 0x41c   :  { %4531 = vmatpush3.bf16.msra.mxu0 %v4530_v44  ;;  %2856 = vmatprep.mubr.f32.mxu1 %v2708_v13 }
 0x41d   :  { %2857 = vmatmul.mubr.f32.vlgmr.msra.gmra.mrb[12].mxu1 %v2706_v4  ;;  %4532 = vmatprep.subr.bf16.mxu0 %v4710_v35 }
 0x41e   :  { %4067 = vmatprep.mubr.msk.f32.mxu0 %vm4712_vm3, %v4713_v18  ;;  %4543 = vmatpush3.bf16.msra.mxu1 %v4542_v5 }
 0x41f   :  { %4544 = vmatprep.subr.bf16.mxu1 %v4710_v35  ;;  %4102 = vmatprep.mubr.msk.f32.mxu1 %vm4712_vm3, %v4713_v18 }
 0x420   :  { %4534 = vmatpush3.bf16.msra.mxu0 %v4533_v56 }
 0x421   :  { %4535 = vmatprep.subr.bf16.mxu0 %v4710_v35 }
 0x422   :  { %4546 = vmatpush3.bf16.msra.mxu1 %v4545_v10 }
 0x423   :  { %4547 = vmatprep.subr.bf16.mxu1 %v4710_v35 }
 0x424   :  { %4537 = vmatpush3.bf16.msra.mxu0 %v4536_v0 }
 0x425   :  { %4538 = vmatprep.subr.bf16.mxu0 %v4710_v35 }
 0x426   :  { %4549 = vmatpush3.bf16.msra.mxu1 %v4548_v53 }
 0x427   :  { %4550 = vmatprep.subr.bf16.mxu1 %v4710_v35 }
 0x428   :  { %4540 = vmatpush3.bf16.msra.mxu0 %v4539_v32 }
 0x42a   :  { %4552 = vmatpush3.bf16.msra.mxu1 %v4551_v59 }
 0x42b   :  { %4068 = vmatmul.mubr.msk.f32.vlgmr.msra.gmra.mrb[18].mxu0 %vm1337_vm15, %v3230_v30  ;;  %4553 = vmatprep.subr.bf16.mxu1 %v4710_v35 }
 0x42e   :  { %4555 = vmatpush3.bf16.msra.mxu1 %v4554_v6 }
 0x42f   :  { %4556 = vmatprep.subr.bf16.mxu1 %v4710_v35 }
 0x432   :  { %4558 = vmatpush3.bf16.msra.mxu1 %v4557_v36 }
 0x433   :  { %4559 = vmatprep.subr.bf16.mxu1 %v4710_v35 }
 0x436   :  { %4561 = vmatpush3.bf16.msra.mxu1 %v4560_v39 }
 0x437   :  { %4562 = vmatprep.subr.bf16.mxu1 %v4710_v35 }
 0x43a   :  { %4564 = vmatpush3.bf16.msra.mxu1 %v4563_v47 }
 0x4ee   :  { %v3519_v54 = vpop.f32.mrb[16].mxu0 }
 0x4ef   :  { %v3520_v62 = vpop.f32.mrb[17].mxu0 }
 0x4f0   :  { %v3521_v17 = vadd.f32 %v3520_v62, %v3519_v54  ;;  %v3554_v34 = vpop.f32.mrb[12].mxu1 }
 0x4f1   :  { %v3555_v50 = vpop.f32.mrb[13].mxu1 }
 0x4f2   :  { %v2789_v35 = vadd.f32 %v3521_v17, %v3229_v55  ;;  %v3556_v45 = vadd.f32 %v3555_v50, %v3554_v34 }
 0x4f4   :  { %v2859_v48 = vadd.f32 %v3556_v45, %v2789_v35 }
 0x4fe   :  { %v2928_v57 = vpop.f32.mrb[18].mxu0 }
 0x4ff   :  { %v2929_v58 = vadd.f32 %v2928_v57, %v2859_v48  ;;  %v4069_v9 = vpop.f32.mrb[19].mxu0 }
 0x501   :  { %v2932_v49 = vmax.f32 %v2929_v58, 0.0 }
 0x503   :  { %4103 = vmatmul.mubr.f32.vlgmr.msra.gmra.mrb[14].mxu1 %v2932_v49 }
 0x5d6   :  { %v3022_v16 = vpop.f32.mrb[14].mxu1 }
 0x5d7   :  { %v3023_v21 = vadd.f32 %v3232_v12, %v3022_v16  ;;  %v4104_v26 = vpop.f32.mrb[15].mxu1 }
 0x5d9   :  { %v3026_v14 = vmax.f32 %v3023_v21, 0.0 }
 0x5db   :  { %v3034_v25 = vmul.f32 %v3233_v27, %v3026_v14 }
 0x5dd   :  { %v3036_v29 = vsel %vm3035_vm4, %v3034_v25, 0.0 }
 0x5de   :  { %3037 = vadd.xlane.f32.xlu0 %v3036_v29 }
 0x66b   :  { %v3038_v33 = vpop.xlane.xlu0 %3037 }
 0x66c   :  { %v3046_v19 = vadd.f32 %v3234_v31, %v3038_v33 }
 0x66e   :  { %v3047_v37 = vsub.f32 0.0, %v3046_v19 }
 0x670   :  { %v3048_v20 = vmul.f32 1.442695, %v3047_v37 }
 0x672   :  { %4627 = vpow2.f32 %v3048_v20 }
 0x67c   :  { %v4628_v22 = vpop.eup %4627 }
 0x67d   :  { %v3050_v63 = vadd.f32 1.0, %v4628_v22 }
 0x67f   :  { %4629 = vrcp.f32 %v3050_v63 }
 0x689   :  { %v4630_v44 = vpop.eup %4629 }
 0x68a   :  { %3054 = vst.msk [vmem:[%s5645_s13] sm:$0x3] %vm3053_vm5, %v4630_v44 }
 0x68b   :  { %3059 = vsyncpa [#allocation7], 1 }
 0x68c   :  { %3060 = vsyncpa [#allocation9], 1 }

</bundles_post_ra>
